<compile_context>
chip_gen: v7x
topology: tpu7x:2x2x1
jax: 0.10.0
libtpu: 0.0.40
codegen_flags: <defaults>
</compile_context>

<pallas_src>
import functools

import jax
import jax.numpy as jnp
from jax import lax
from jax.experimental import pallas as pl
from jax.experimental.pallas import tpu as pltpu


def _round_up(x, m):
    return ((x + m - 1) // m) * m


def _vmem_capacity_bytes():
    """Physical VMEM per TensorCore (fallback: conservative 64 MiB, v7x)."""
    try:
        info = pltpu.get_tpu_info()
        cap = getattr(info, "vmem_capacity_bytes", None)
        if cap:
            return int(cap)
    except Exception:
        pass
    return 64 * 1024 * 1024


def _estimate_vmem(TQ, Np, C, cq_pad, att_itemsize):
    """Rough per-core working-set estimate (bytes) for a given query tile."""
    lane = lambda d: max(d, 128)
    fixed = (2 * C * Np * 4                 # x slab (double-buffered, f32)
             + cq_pad * Np * 2              # K scratch (bf16)
             + Np * lane(cq_pad) * 2        # Q^T scratch (bf16, lane-padded)
             + Np * lane(C) * 2             # V^T scratch (bf16, lane-padded)
             + 2 * (2 * cq_pad + C) * lane(C) * 4)   # packed weights + bias
    per_tile = (TQ * Np * (4 + 4 + 2)       # energy f32, p f32, p bf16
                + 3 * TQ * Np * att_itemsize  # att value + dbl-buffered out block
                + 2 * TQ * lane(C) * 4      # (TQ,C) result + transpose
                + 2 * 2 * 2 * C * TQ * 4)   # final + weighted out blocks (dbuf)
    return fixed + per_tile


def _pick_tq(Np, budget, C, cq_pad, att_itemsize, max_tq=1024):
    """Largest lane-dense query tile dividing Np that fits the VMEM budget.
    Prefers multiples of 256 (full MXU result tile on v6e/v7x)."""
    max_tq = max(128, max_tq)
    for step in (256, 128):
        tq = (min(Np, max_tq) // step) * step
        while tq >= step:
            if Np % tq == 0 and _estimate_vmem(tq, Np, C, cq_pad, att_itemsize) <= budget:
                return tq
            tq -= step
    return 128


def _self_attn_kernel(x_ref, w_ref, b_ref, gamma_ref,
                      final_ref, weighted_ref, att_ref,
                      k_sc, qT_sc, vT_sc, *, C, cq_pad, TQ, N, Np):
    qi = pl.program_id(1)

    # One fused MXU pass per batch element produces all projections; results
    # stay resident (bf16) in VMEM scratch for every query tile of this batch.
    # Packed weight rows: [0:cq_pad)=Q (zero-padded), [cq_pad:cq_pad+C)=V,
    # [cq_pad+C:)=K (zero-padded).  Padded channels are 0 -> no effect.
    @pl.when(qi == 0)
    def _():
        xb = x_ref[0]                                                    # (C, Np)
        proj = (jnp.dot(w_ref[...], xb, preferred_element_type=jnp.float32)
                + b_ref[...])                                            # (2cq+C, Np)
        qT_sc[...] = proj[0:cq_pad, :].astype(jnp.bfloat16).T            # (Np, cq)
        vT_sc[...] = proj[cq_pad:cq_pad + C, :].astype(jnp.bfloat16).T   # (Np, C)
        k_sc[...] = proj[cq_pad + C:, :].astype(jnp.bfloat16)            # (cq, Np)

    qstart = pl.multiple_of(qi * TQ, TQ)

    # energy[i, j] = sum_c Q[c, qstart+i] * K[c, j]  (torch.bmm(Q^T, K) tile)
    q_t = qT_sc[pl.ds(qstart, TQ), :]                                    # (TQ, cq) bf16
    energy = jnp.dot(q_t, k_sc[...],
                     preferred_element_type=jnp.float32)                 # (TQ, Np) f32
    if Np != N:
        # padded key columns must not participate in the softmax
        col = lax.broadcasted_iota(jnp.int32, (TQ, Np), 1)
        energy = jnp.where(col < N, energy, jnp.float32(-1e30))

    # Row-wise softmax, normalization deferred to after the PV matmul.
    e_max = jnp.max(energy, axis=-1, keepdims=True)
    p = jnp.exp(energy - e_max)                                          # (TQ, Np)
    denom = jnp.sum(p, axis=-1, keepdims=True)                           # (TQ, 1)
    recip = pl.reciprocal(denom, approx=False)                           # exact (EUP)

    # out[c, i] = sum_j V[c, j] * att[i, j]  == (p @ V^T)_(i,c) * recip_i
    out_un = jnp.dot(p.astype(jnp.bfloat16), vT_sc[...],
                     preferred_element_type=jnp.float32)                 # (TQ, C)
    out = (out_un * recip).T                                             # (C, TQ)

    gamma = gamma_ref[0, 0]
    weighted = gamma * out
    x_tile = x_ref[0, :, pl.ds(qstart, TQ)]                              # (C, TQ)
    final_ref[0] = (weighted + x_tile).astype(final_ref.dtype)
    weighted_ref[0] = weighted.astype(weighted_ref.dtype)
    att_ref[0] = (p * recip).astype(att_ref.dtype)


def self_attn(x, wq, bq, wk, bk, wv, bv, gamma, *, max_tq=1024, att_dtype=None):
    """x: (B, C, W, H) float32.  Returns (final, weighted_out, attention).

    att_dtype=jnp.bfloat16 halves the dominant (B, N, N) HBM writeback stream
    (the module's API still returns the attention tensor, so it is always
    written; pass bf16 when downstream consumers tolerate it)."""
    B, C, W, H = x.shape
    N = W * H
    Np = _round_up(N, 128)                 # lane-dense padded sequence length
    Cq = wq.shape[0]
    cq_pad = max(16, _round_up(Cq, 16))    # bf16 sublane packing
    rows = 2 * cq_pad + C
    att_dtype = x.dtype if att_dtype is None else att_dtype
    att_itemsize = jnp.dtype(att_dtype).itemsize

    cap = _vmem_capacity_bytes()
    TQ = _pick_tq(Np, int(0.5 * cap), C, cq_pad, att_itemsize, max_tq=max_tq)
    n_qt = Np // TQ

    x_flat = x.reshape(B, C, N)
    if Np != N:
        x_flat = jnp.pad(x_flat, ((0, 0), (0, 0), (0, Np - N)))

    # Pack [Q(zero-padded) ; V ; K(zero-padded)] so one MXU pass yields all three.
    pad = cq_pad - Cq
    wq_p = jnp.pad(wq, ((0, pad), (0, 0)))
    wk_p = jnp.pad(wk, ((0, pad), (0, 0)))
    bq_p = jnp.pad(bq, (0, pad))
    bk_p = jnp.pad(bk, (0, pad))
    w_pack = jnp.concatenate([wq_p, wv, wk_p], axis=0).astype(jnp.float32)
    b_pack = jnp.concatenate([bq_p, bv, bk_p], axis=0).reshape(-1, 1).astype(jnp.float32)

    out_shapes = (
        jax.ShapeDtypeStruct((B, C, Np), x.dtype),    # final
        jax.ShapeDtypeStruct((B, C, Np), x.dtype),    # weighted_out
        jax.ShapeDtypeStruct((B, Np, Np), att_dtype), # attention
    )

    grid_spec = pltpu.PrefetchScalarGridSpec(
        num_scalar_prefetch=0,
        grid=(B, n_qt),
        in_specs=[
            pl.BlockSpec((1, C, Np), lambda b, q: (b, 0, 0)),   # x slab (per batch)
            pl.BlockSpec((rows, C), lambda b, q: (0, 0)),       # packed QKV weight
            pl.BlockSpec((rows, 1), lambda b, q: (0, 0)),       # packed QKV bias
            pl.BlockSpec(memory_space=pltpu.MemorySpace.SMEM),  # gamma scalar
        ],
        out_specs=[
            pl.BlockSpec((1, C, TQ), lambda b, q: (b, 0, q)),
            pl.BlockSpec((1, C, TQ), lambda b, q: (b, 0, q)),
            pl.BlockSpec((1, TQ, Np), lambda b, q: (b, q, 0)),
        ],
        scratch_shapes=[
            pltpu.VMEM((cq_pad, Np), jnp.bfloat16),   # K
            pltpu.VMEM((Np, cq_pad), jnp.bfloat16),   # Q^T
            pltpu.VMEM((Np, C), jnp.bfloat16),        # V^T
        ],
    )

    est = _estimate_vmem(TQ, Np, C, cq_pad, att_itemsize)
    vmem_limit = int(min(max(int(1.5 * est), 32 * 1024 * 1024), int(0.92 * cap)))

    kernel = functools.partial(_self_attn_kernel,
                               C=C, cq_pad=cq_pad, TQ=TQ, N=N, Np=Np)

    final_p, weighted_p, att_p = pl.pallas_call(
        kernel,
        out_shape=out_shapes,
        grid_spec=grid_spec,
        compiler_params=pltpu.CompilerParams(
            # batch axis shards across TensorCores; query axis reuses the
            # per-batch K/Q^T/V^T scratch so it must stay on one core.
            dimension_semantics=("parallel", "arbitrary"),
            vmem_limit_bytes=vmem_limit,
        ),
    )(x_flat, w_pack, b_pack, gamma.reshape(1, 1).astype(jnp.float32))

    final = final_p[:, :, :N].reshape(B, C, W, H)
    weighted = weighted_p[:, :, :N].reshape(B, C, W, H)
    att = att_p[:, :N, :N]
    return final, weighted, att


def self_attn_ref(x, wq, bq, wk, bk, wv, bv, gamma):
    """Pure-JAX reference mirroring the PyTorch forward (for correctness check)."""
    B, C, W, H = x.shape
    N = W * H
    xf = x.reshape(B, C, N)
    q = jnp.einsum('oc,bcn->bon', wq, xf) + bq[None, :, None]
    k = jnp.einsum('oc,bcn->bon', wk, xf) + bk[None, :, None]
    v = jnp.einsum('oc,bcn->bon', wv, xf) + bv[None, :, None]
    energy = jnp.einsum('bci,bcj->bij', q, k)
    att = jax.nn.softmax(energy, axis=-1)
    out = jnp.einsum('bcj,bij->bci', v, att)
    weighted = gamma[0] * out
    final = weighted + xf
    return (final.reshape(B, C, W, H), weighted.reshape(B, C, W, H), att)


if __name__ == "__main__":
    # Shapes consistent with Self_Attn(in_dim=32, factor=8): Cq = 32 // 8 = 4.
    # W = H = 16 -> N = 256; max_tq=128 forces the tiled query path (grid=(B, 2)).
    B, C, W, H = 2, 32, 16, 16
    factor = 8
    Cq = C // factor

    key = jax.random.PRNGKey(0)
    kx, kwq, kbq, kwk, kbk, kwv, kbv = jax.random.split(key, 7)

    x = jax.random.normal(kx, (B, C, W, H), dtype=jnp.float32)

    # 1x1 conv weights (out_channels, in_channels); deterministic synthetic init.
    wq = jax.random.normal(kwq, (Cq, C), dtype=jnp.float32) * 0.1
    bq = jax.random.normal(kbq, (Cq,), dtype=jnp.float32) * 0.1
    wk = jax.random.normal(kwk, (Cq, C), dtype=jnp.float32) * 0.1
    bk = jax.random.normal(kbk, (Cq,), dtype=jnp.float32) * 0.1
    wv = jax.random.normal(kwv, (C, C), dtype=jnp.float32) * 0.1
    bv = jax.random.normal(kbv, (C,), dtype=jnp.float32) * 0.1
    # nn.Parameter(torch.zeros(1)) in the module; nonzero here so the weighted
    # branch is actually exercised.
    gamma = jnp.array([0.5], dtype=jnp.float32)

    final, weighted, att = self_attn(x, wq, bq, wk, bk, wv, bv, gamma, max_tq=128)
    jax.block_until_ready((final, weighted, att))

    ref_final, ref_weighted, ref_att = self_attn_ref(x, wq, bq, wk, bk, wv, bv, gamma)
    # Tolerances account for bf16 MXU operands (f32 accumulation).
    assert jnp.allclose(final, ref_final, atol=1e-2, rtol=1e-2)
    assert jnp.allclose(weighted, ref_weighted, atol=1e-2, rtol=1e-2)
    assert jnp.allclose(att, ref_att, atol=1e-3, rtol=1e-2)
    # exact reciprocal on the attention path -> rows sum to 1 at f32 precision
    assert jnp.allclose(jnp.sum(att, axis=-1), 1.0, atol=1e-3)

    print("KERNEL_OK")
</pallas_src>

<mosaic_0001>
module attributes {stable_mosaic.version = 11 : i64} {
  func.func @_self_attn_kernel(%arg0: i32, %arg1: i32, %arg2: memref<1x32x256xf32, #tpu.memory_space<vmem>>, %arg3: memref<64x32xf32, #tpu.memory_space<vmem>>, %arg4: memref<64x1xf32, #tpu.memory_space<vmem>>, %arg5: memref<1x1xf32, #tpu.memory_space<smem>>, %arg6: memref<1x32x128xf32, #tpu.memory_space<vmem>>, %arg7: memref<1x32x128xf32, #tpu.memory_space<vmem>>, %arg8: memref<1x128x256xf32, #tpu.memory_space<vmem>>, %arg9: memref<16x256xbf16, #tpu.memory_space<vmem>>, %arg10: memref<256x16xbf16, #tpu.memory_space<vmem>>, %arg11: memref<256x32xbf16, #tpu.memory_space<vmem>>) attributes {dimension_semantics = [#tpu.dimension_semantics<parallel>, #tpu.dimension_semantics<arbitrary>], iteration_bounds = array<i64: 2, 2>, scalar_prefetch = 0 : i64, scratch_operands = 3 : i64, tpu.core_type = #tpu.core_type<tc>, window_params = [{transform_indices = @transform_0, window_bounds = array<i64: 1, 32, 256>}, {pipeline_mode = #tpu.pipeline_mode<synchronous>, transform_indices = @transform_1, window_bounds = array<i64: 64, 32>}, {pipeline_mode = #tpu.pipeline_mode<synchronous>, transform_indices = @transform_2, window_bounds = array<i64: 64, 1>}, {transform_indices = @transform_3, window_bounds = array<i64: 1, 1>}, {transform_indices = @transform_4, window_bounds = array<i64: 1, 32, 128>}, {transform_indices = @transform_5, window_bounds = array<i64: 1, 32, 128>}, {transform_indices = @transform_6, window_bounds = array<i64: 1, 128, 256>}]} {
    %c0_i32 = arith.constant 0 : i32
    %0 = arith.cmpi eq, %arg1, %c0_i32 : i32
    %1 = arith.extui %0 : i1 to i32
    %c0_i32_0 = arith.constant 0 : i32
    %2 = arith.cmpi ne, %1, %c0_i32_0 : i32
    scf.if %2 {
      %c0_21 = arith.constant 0 : index
      %c0_22 = arith.constant 0 : index
      %c0_23 = arith.constant 0 : index
      %41 = vector.load %arg2[%c0_21, %c0_22, %c0_23] : memref<1x32x256xf32, #tpu.memory_space<vmem>>, vector<1x32x256xf32>
      %42 = vector.shape_cast %41 : vector<1x32x256xf32> to vector<32x256xf32>
      %c0_24 = arith.constant 0 : index
      %c0_25 = arith.constant 0 : index
      %43 = vector.load %arg3[%c0_24, %c0_25] : memref<64x32xf32, #tpu.memory_space<vmem>>, vector<64x32xf32>
      %cst_26 = arith.constant dense<0.000000e+00> : vector<64x256xf32>
      %44 = tpu.matmul %43, %42, %cst_26 {dimension_numbers = #tpu.dot_dimension_numbers<[1], [0], [0], [1], [0, 0, 1, 1], [], []>} : vector<64x32xf32>, vector<32x256xf32>, vector<64x256xf32> -> vector<64x256xf32>
      %c0_27 = arith.constant 0 : index
      %c0_28 = arith.constant 0 : index
      %45 = vector.load %arg4[%c0_27, %c0_28] : memref<64x1xf32, #tpu.memory_space<vmem>>, vector<64x1xf32>
      %46 = vector.broadcast %45 : vector<64x1xf32> to vector<64x256xf32>
      %47 = arith.addf %44, %46 : vector<64x256xf32>
      %48 = vector.extract_strided_slice %47 {offsets = [0, 0], sizes = [16, 256], strides = [1, 1]} : vector<64x256xf32> to vector<16x256xf32>
      %49 = arith.truncf %48 : vector<16x256xf32> to vector<16x256xbf16>
      %50 = tpu.transpose %49, [1, 0] : vector<16x256xbf16> -> vector<256x16xbf16>
      %c0_29 = arith.constant 0 : index
      %c0_30 = arith.constant 0 : index
      %51 = vector.load %arg10[%c0_29, %c0_30] : memref<256x16xbf16, #tpu.memory_space<vmem>>, vector<256x16xbf16>
      tpu.vector_store %arg10[%c0_29, %c0_30], %50 {strides = array<i32>} : memref<256x16xbf16, #tpu.memory_space<vmem>>, vector<256x16xbf16>,
      %52 = vector.extract_strided_slice %47 {offsets = [16, 0], sizes = [32, 256], strides = [1, 1]} : vector<64x256xf32> to vector<32x256xf32>
      %53 = arith.truncf %52 : vector<32x256xf32> to vector<32x256xbf16>
      %54 = tpu.transpose %53, [1, 0] : vector<32x256xbf16> -> vector<256x32xbf16>
      %c0_31 = arith.constant 0 : index
      %c0_32 = arith.constant 0 : index
      %55 = vector.load %arg11[%c0_31, %c0_32] : memref<256x32xbf16, #tpu.memory_space<vmem>>, vector<256x32xbf16>
      tpu.vector_store %arg11[%c0_31, %c0_32], %54 {strides = array<i32>} : memref<256x32xbf16, #tpu.memory_space<vmem>>, vector<256x32xbf16>,
      %56 = vector.extract_strided_slice %47 {offsets = [48, 0], sizes = [16, 256], strides = [1, 1]} : vector<64x256xf32> to vector<16x256xf32>
      %57 = arith.truncf %56 : vector<16x256xf32> to vector<16x256xbf16>
      %c0_33 = arith.constant 0 : index
      %c0_34 = arith.constant 0 : index
      %58 = vector.load %arg9[%c0_33, %c0_34] : memref<16x256xbf16, #tpu.memory_space<vmem>>, vector<16x256xbf16>
      tpu.vector_store %arg9[%c0_33, %c0_34], %57 {strides = array<i32>} : memref<16x256xbf16, #tpu.memory_space<vmem>>, vector<16x256xbf16>,
    } else {
    }
    %c128_i32 = arith.constant 128 : i32
    %3 = arith.muli %arg1, %c128_i32 : i32
    %4 = tpu.assume_multiple %3, 128 : i32
    %5 = arith.index_cast %4 : i32 to index
    %c0 = arith.constant 0 : index
    %6 = vector.load %arg10[%5, %c0] : memref<256x16xbf16, #tpu.memory_space<vmem>>, vector<128x16xbf16>
    %c0_1 = arith.constant 0 : index
    %c0_2 = arith.constant 0 : index
    %7 = vector.load %arg9[%c0_1, %c0_2] : memref<16x256xbf16, #tpu.memory_space<vmem>>, vector<16x256xbf16>
    %cst = arith.constant dense<0.000000e+00> : vector<128x256xf32>
    %8 = tpu.matmul %6, %7, %cst {dimension_numbers = #tpu.dot_dimension_numbers<[1], [0], [0], [1], [0, 0, 1, 1], [], []>} : vector<128x16xbf16>, vector<16x256xbf16>, vector<128x256xf32> -> vector<128x256xf32>
    %cst_3 = arith.constant dense<0xFF800000> : vector<128xf32>
    %9 = vector.multi_reduction <maximumf>, %8, %cst_3 [1] : vector<128x256xf32> to vector<128xf32>
    %10 = vector.shape_cast %9 : vector<128xf32> to vector<128x1xf32>
    %11 = vector.broadcast %10 : vector<128x1xf32> to vector<128x256xf32>
    %12 = arith.subf %8, %11 : vector<128x256xf32>
    %13 = math.exp %12 : vector<128x256xf32>
    %cst_4 = arith.constant dense<0.000000e+00> : vector<128xf32>
    %14 = vector.multi_reduction <add>, %13, %cst_4 [1] : vector<128x256xf32> to vector<128xf32>
    %15 = vector.shape_cast %14 : vector<128xf32> to vector<128x1xf32>
    %16 = tpu.reciprocal %15 : vector<128x1xf32> -> vector<128x1xf32>
    %17 = arith.truncf %13 : vector<128x256xf32> to vector<128x256xbf16>
    %c0_5 = arith.constant 0 : index
    %c0_6 = arith.constant 0 : index
    %18 = vector.load %arg11[%c0_5, %c0_6] : memref<256x32xbf16, #tpu.memory_space<vmem>>, vector<256x32xbf16>
    %cst_7 = arith.constant dense<0.000000e+00> : vector<128x32xf32>
    %19 = tpu.matmul %17, %18, %cst_7 {dimension_numbers = #tpu.dot_dimension_numbers<[1], [0], [0], [1], [0, 0, 1, 1], [], []>} : vector<128x256xbf16>, vector<256x32xbf16>, vector<128x32xf32> -> vector<128x32xf32>
    %20 = vector.broadcast %16 : vector<128x1xf32> to vector<128x32xf32>
    %21 = arith.mulf %19, %20 : vector<128x32xf32>
    %22 = tpu.transpose %21, [1, 0] : vector<128x32xf32> -> vector<32x128xf32>
    %c0_8 = arith.constant 0 : index
    %c0_9 = arith.constant 0 : index
    %23 = memref.load %arg5[%c0_8, %c0_9] : memref<1x1xf32, #tpu.memory_space<smem>>
    %24 = vector.broadcast %23 : f32 to vector<32x128xf32>
    %25 = arith.mulf %24, %22 : vector<32x128xf32>
    %c0_10 = arith.constant 0 : index
    %c0_11 = arith.constant 0 : index
    %26 = arith.index_cast %4 : i32 to index
    %27 = vector.load %arg2[%c0_10, %c0_11, %26] : memref<1x32x256xf32, #tpu.memory_space<vmem>>, vector<1x32x128xf32>
    %28 = vector.shape_cast %27 : vector<1x32x128xf32> to vector<32x128xf32>
    %29 = arith.addf %25, %28 : vector<32x128xf32>
    %c0_12 = arith.constant 0 : index
    %c0_13 = arith.constant 0 : index
    %c0_14 = arith.constant 0 : index
    %30 = vector.load %arg6[%c0_12, %c0_13, %c0_14] : memref<1x32x128xf32, #tpu.memory_space<vmem>>, vector<1x32x128xf32>
    %31 = vector.shape_cast %30 : vector<1x32x128xf32> to vector<32x128xf32>
    %32 = vector.shape_cast %29 : vector<32x128xf32> to vector<1x32x128xf32>
    tpu.vector_store %arg6[%c0_12, %c0_13, %c0_14], %32 {strides = array<i32>} : memref<1x32x128xf32, #tpu.memory_space<vmem>>, vector<1x32x128xf32>,
    %c0_15 = arith.constant 0 : index
    %c0_16 = arith.constant 0 : index
    %c0_17 = arith.constant 0 : index
    %33 = vector.load %arg7[%c0_15, %c0_16, %c0_17] : memref<1x32x128xf32, #tpu.memory_space<vmem>>, vector<1x32x128xf32>
    %34 = vector.shape_cast %33 : vector<1x32x128xf32> to vector<32x128xf32>
    %35 = vector.shape_cast %25 : vector<32x128xf32> to vector<1x32x128xf32>
    tpu.vector_store %arg7[%c0_15, %c0_16, %c0_17], %35 {strides = array<i32>} : memref<1x32x128xf32, #tpu.memory_space<vmem>>, vector<1x32x128xf32>,
    %36 = vector.broadcast %16 : vector<128x1xf32> to vector<128x256xf32>
    %37 = arith.mulf %13, %36 : vector<128x256xf32>
    %c0_18 = arith.constant 0 : index
    %c0_19 = arith.constant 0 : index
    %c0_20 = arith.constant 0 : index
    %38 = vector.load %arg8[%c0_18, %c0_19, %c0_20] : memref<1x128x256xf32, #tpu.memory_space<vmem>>, vector<1x128x256xf32>
    %39 = vector.shape_cast %38 : vector<1x128x256xf32> to vector<128x256xf32>
    %40 = vector.shape_cast %37 : vector<128x256xf32> to vector<1x128x256xf32>
    tpu.vector_store %arg8[%c0_18, %c0_19, %c0_20], %40 {strides = array<i32>} : memref<1x128x256xf32, #tpu.memory_space<vmem>>, vector<1x128x256xf32>,
    return
  }
  func.func @transform_0(%arg0: i32, %arg1: i32) -> (i32, i32, i32) {
    %c0_i32 = arith.constant 0 : i32
    %c0_i32_0 = arith.constant 0 : i32
    %c0_i32_1 = arith.constant 0 : i32
    return %arg0, %c0_i32, %c0_i32_0 : i32, i32, i32
  }
  func.func @transform_1(%arg0: i32, %arg1: i32) -> (i32, i32) {
    %c0_i32 = arith.constant 0 : i32
    %c0_i32_0 = arith.constant 0 : i32
    %c0_i32_1 = arith.constant 0 : i32
    return %c0_i32, %c0_i32_0 : i32, i32
  }
  func.func @transform_2(%arg0: i32, %arg1: i32) -> (i32, i32) {
    %c0_i32 = arith.constant 0 : i32
    %c0_i32_0 = arith.constant 0 : i32
    %c0_i32_1 = arith.constant 0 : i32
    return %c0_i32, %c0_i32_0 : i32, i32
  }
  func.func @transform_3(%arg0: i32, %arg1: i32) -> (i32, i32) {
    %c0_i32 = arith.constant 0 : i32
    %c0_i32_0 = arith.constant 0 : i32
    %c0_i32_1 = arith.constant 0 : i32
    return %c0_i32, %c0_i32_0 : i32, i32
  }
  func.func @transform_4(%arg0: i32, %arg1: i32) -> (i32, i32, i32) {
    %c0_i32 = arith.constant 0 : i32
    %c0_i32_0 = arith.constant 0 : i32
    return %arg0, %c0_i32, %arg1 : i32, i32, i32
  }
  func.func @transform_5(%arg0: i32, %arg1: i32) -> (i32, i32, i32) {
    %c0_i32 = arith.constant 0 : i32
    %c0_i32_0 = arith.constant 0 : i32
    return %arg0, %c0_i32, %arg1 : i32, i32, i32
  }
  func.func @transform_6(%arg0: i32, %arg1: i32) -> (i32, i32, i32) {
    %c0_i32 = arith.constant 0 : i32
    %c0_i32_0 = arith.constant 0 : i32
    return %arg0, %arg1, %c0_i32 : i32, i32, i32
  }
}

</mosaic_0001>

<bundles_post_ra>
// kernel: tpu_custom_call.1
= control target key start
LH: loop header
LB: loop body
LE: loop exit
PB: predicated region body
PF: predicated region fallthrough
CT: control target
= control target key end

     0   :  { %s2725_s0 = inlined_call_operand.vmem [shape: f32[2,32,256], index: 0, kind: input, shape index: {}]   ;;  %s2726_s1 = inlined_call_operand.vmem [shape: f32[64,32], index: 1, kind: input, shape index: {}]   ;;  %s2727_s2 = inlined_call_operand.vmem [shape: f32[64,1], index: 2, kind: input, shape index: {}]   ;;  %s2728_s3 = inlined_call_operand.<no memory space> [shape: f32[1,1], index: 3, kind: input, shape index: {}]   ;;  %s2729_s4 = inlined_call_operand.hbm [shape: f32[2,32,256], index: 4, kind: output, shape index: {0}]   ;;  %s2730_s5 = inlined_call_operand.hbm [shape: f32[2,32,256], index: 5, kind: output, shape index: {1}]   ;;  %s2731_s6 = inlined_call_operand.hbm [shape: f32[2,256,256], index: 6, kind: output, shape index: {2}]  }
   0x1   :  { %2737 = sst [smem:[#allocation16_spill]] %s2725_s0 }
   0x2   :  { %2738 = sst [smem:[#allocation17_spill]] %s2726_s1 }
   0x3   :  { %2739 = sst [smem:[#allocation18_spill]] %s2727_s2 }
   0x4   :  { %12 = sst [smem:[#allocation5]] %s2728_s3 }
   0x5   :  { %13 = vsyncpa [#allocation7], 0 }
   0x6   :  { %15 = vsyncpa [#allocation7 + $0x1], 0 }
   0x7   :  { %16 = vsyncpa [#allocation9], 0 }
   0x8   :  { %18 = vsyncpa [#allocation9 + $0x1], 0  ;;  %s1963_s23 = smov 0   ;;  %s1965_s24 = smov 0  }
   0x9   :  { %s1967_s25 = smov 0   ;;  %s1969_s26 = smov 0  }
   0xa   :  { %s1971_s27 = smov 0   ;;  %s1973_s28 = smov 0  }
   0xb   :  { %s1975_s29 = smov 0   ;;  %s1977_s30 = smov 0  }
   0xc LB: > { %2740 = sst [smem:[#allocation13_spill]] %s1909_s29  ;;  %s2733_s3 = sadd.s32 4294967295, %s1913_s30   ;;  %s1913_s30 = sphi %s1977_s30, %s24_s30   ;;  %s1909_s29 = sphi %s1975_s29, %s2752_s29   ;;  %s1905_s28 = sphi %s1973_s28, %s2757_s28   ;;  %s1901_s27 = sphi %s1971_s27, %s2750_s27   ;;  %s1897_s26 = sphi %s1969_s26, %s2756_s26   ;;  %s1893_s25 = sphi %s1967_s25, %s2755_s25   ;;  %s1889_s24 = sphi %s1965_s24, %s2754_s24   ;;  %s1885_s23 = sphi %s1963_s23, %s2753_s23  }
   0xd   : > { %s2732_s7 = sadd.s32 4294967294, %s1913_s30   ;;  %s33_s8 = sadd.s32 1, %s1905_s28 }
   0xe   : > { %p34_p0 = scmp.ge.s32.totalorder %s33_s8, 2  ;;  %s36_s9 = sadd.s32 1, %s1909_s29 }
   0xf   : > { %p144_p1 = scmp.ne.s32.totalorder %s1893_s25, %s1889_s24  ;;  %p145_p2 = scmp.eq.s32.totalorder %s2733_s3, 3 }
  0x10   : > { %s2759_s8 = smov (%p34_p0, %s33_s8), 0  ;;  %s2761_s9 = smov (!%p34_p0, %s36_s9), %s1909_s29 }
  0x11   : > { %2741 = sst [smem:[#allocation14_spill]] %s2759_s8  ;;  %s130_s10 = ssub.s32 %s1905_s28, %s2759_s8 }
  0x12   : > { %p2016_p3 = por %p145_p2, %p144_p1  ;;  %p38_p4 = scmp.ge.s32.totalorder %s2761_s9, 2 }
  0x13   : > { %p150_p5 = scmp.ne.s32.totalorder %s1889_s24, %s1885_s23  ;;  %p151_p6 = scmp.eq.s32.totalorder %s2732_s7, 3 }
  0x14   : > { %p1440_p7 = scmp.ge.s32.totalorder %s1913_s30, 1  ;;  %s2763_s9 = smov (%p38_p4, %s2761_s9), 0 }
  0x15   : > { %2743 = sst [smem:[#allocation15_spill]] %s2763_s9  ;;  %p2027_p8 = por %p151_p6, %p150_p5 }
  0x16   : > { %p242_p9 = scmp.lt.s32.totalorder %s1913_s30, 5  ;;  %s129_s13 = ssub.s32 %s1909_s29, %s2763_s9 }
  0x17   : > { %s134_s14 = sadd.s32 1, %s1893_s25  ;;  %s131_s15 = sor.u32 %s130_s10, %s129_s13 }
  0x18   : > { %p243_p10 = pnand %p1440_p7, %p242_p9  ;;  %p132_p11 = scmp.eq.s32.totalorder %s131_s15, 0 }
  0x19   : > { %s2039_s17 = sand.u32 (!%p243_p10), 1, %s1889_s24   ;;  %p282_p12 = scmp.lt.s32.totalorder (!%p243_p10), %s1901_s27, 1 }
  0x1a   : > { %s2036_s16 = scalar_select %p132_p11, %s1893_s25, %s134_s14  }
  0x1b   : > { %246 = sbr.rel (%p243_p10) target bundleno = 1266 (0x4f2), region = 36  ;;  %s1441_s18 = sshll.u32 (!%p243_p10), %s2039_s17, 5 }
  0x1c   : > { %s1443_s19 = sshll.u32 (!%p243_p10), %s2039_s17, 8  ;;  %s2745_s0 = sld [smem:[#allocation16_spill]] (!%p243_p10) }
  0x1d   : > { %s2050_s13 = scalar_lea.vmem (!%p243_p10), [#allocation6], %s1441_s18  ;;  %s2052_s14 = scalar_lea.vmem (!%p243_p10), [#allocation8], %s1441_s18 }
  0x1e   : > { %s2054_s15 = scalar_lea.vmem (!%p243_p10), [#allocation10], %s1443_s19  ;;  %p1446_p13 = scmp.ne.s32.totalorder (!%p243_p10), %s1897_s26, 0 }
  0x22   : > { %s283_s20 = scalar_select %p282_p12, %s1901_s27, 1 }
  0x23   : > { %292 = sbr.rel (%p1446_p13) target bundleno = 434 (0x1b2), region = 40  ;;  %v1915_v7 = vmov (!%p1446_p13), 0.0   ;;  %v1916_v12 = vmov (!%p1446_p13), 0   ;;  %s2746_s2 = sld [smem:[#allocation18_spill]] (!%p1446_p13)  ;;  %vm357_vm0 = vcmask (!%p1446_p13), 261120   ;;  %vm529_vm1 = vcmask (!%p1446_p13), 130048  }
  0x24   : > { %s1479_s21 = sshll.u32 %s283_s20, 6  ;;  %446 = vmatprep.mubr.f32.mxu0 (!%p1446_p13), %v1915_v7  ;;  %470 = vmatprep.mubr.f32.mxu1 (!%p1446_p13), %v1915_v7  ;;  %s2747_s1 = sld [smem:[#allocation17_spill]] (!%p1446_p13) }
  0x25   : > { %s2048_s10 = scalar_lea.vmem %s2745_s0, %s1479_s21  ;;  %1662 = vset.pattern.permute.xlu1 (!%p1446_p13), %v1916_v12  ;;  %1661 = vset.pattern.permute.xlu0 (!%p1446_p13), %v1916_v12 }
  0x26   : > { %v294_v0 = vld [vmem:[%s2048_s10 + $0x8] sm:$0xff] (!%p1446_p13)  ;;  %v296_v1 = vld [vmem:[%s2048_s10 + $0x18] sm:$0xff] (!%p1446_p13)  ;;  %v293_v2 = vld [vmem:[%s2048_s10] sm:$0xff] (!%p1446_p13) }
  0x27   : > { %v1545_v3 = vpack.c.bf16 (!%p1446_p13), %v296_v1, %v294_v0  ;;  %v295_v4 = vld [vmem:[%s2048_s10 + $0x10] sm:$0xff] (!%p1446_p13)  ;;  %v298_v5 = vld [vmem:[%s2048_s10 + $0x28] sm:$0xff] (!%p1446_p13)  ;;  %v300_v6 = vld [vmem:[%s2048_s10 + $0x38] sm:$0xff] (!%p1446_p13) }
  0x28   : > { %v1547_v8 = vpack.c.bf16 (!%p1446_p13), %v295_v4, %v293_v2  ;;  %v1549_v9 = vpack.c.bf16 (!%p1446_p13), %v300_v6, %v298_v5  ;;  %v297_v10 = vld [vmem:[%s2048_s10 + $0x20] sm:$0xff] (!%p1446_p13)  ;;  %v299_v11 = vld [vmem:[%s2048_s10 + $0x30] sm:$0xff] (!%p1446_p13) }
  0x29   : > { %1546 = vmatprep.subr.bf16.mxu0 (!%p1446_p13), %v1545_v3  ;;  %1553 = vmatprep.subr.bf16.mxu1 (!%p1446_p13), %v1545_v3  ;;  %v1551_v13 = vpack.c.bf16 (!%p1446_p13), %v299_v11, %v297_v10  ;;  %v309_v14 = vld [vmem:[%s2746_s2] sm:$0xff] (!%p1446_p13)  ;;  %v311_v15 = vld [vmem:[%s2746_s2 + $0x10] sm:$0xff] (!%p1446_p13)  ;;  %v310_v16 = vld [vmem:[%s2746_s2 + $0x8] sm:$0xff] (!%p1446_p13) }
  0x2a   : > { %1548 = vmatpush1.bf16.msra.mxu0 %v1547_v8  ;;  %1555 = vmatpush1.bf16.msra.mxu1 %v1547_v8  ;;  %v301_v17 = vld [vmem:[%s2747_s1] sm:$0xff]  ;;  %v312_v19 = vld [vmem:[%s2746_s2 + $0x18] sm:$0xff]  ;;  %v314_v20 = vld [vmem:[%s2746_s2 + $0x28] sm:$0xff] }
  0x2b   : > { %1550 = vmatprep.subr.bf16.mxu0 %v1549_v9  ;;  %1554 = vmatprep.subr.bf16.mxu1 %v1549_v9  ;;  %v305_v18 = vld [vmem:[%s2747_s1 + $0x20] sm:$0xff]  ;;  %v302_v21 = vld [vmem:[%s2747_s1 + $0x8] sm:$0xff]  ;;  %v316_v24 = vld [vmem:[%s2746_s2 + $0x38] sm:$0xff] }
  0x2c   : > { %319 = vperm.xlu1 %1662, %v309_v14   ;;  %329 = vperm.xlu0 %1661, %v311_v15   ;;  %v306_v22 = vld [vmem:[%s2747_s1 + $0x28] sm:$0xff]  ;;  %v313_v23 = vld [vmem:[%s2746_s2 + $0x20] sm:$0xff]  ;;  %v307_v25 = vld [vmem:[%s2747_s1 + $0x30] sm:$0xff] }
  0x2d   : > { %v303_v26 = vld [vmem:[%s2747_s1 + $0x10] sm:$0xff]  ;;  %v308_v28 = vld [vmem:[%s2747_s1 + $0x38] sm:$0xff] }
  0x2e   : > { %1552 = vmatpush1.bf16.msra.mxu0 %v1551_v13  ;;  %1556 = vmatpush1.bf16.msra.mxu1 %v1551_v13  ;;  %v315_v27 = vld [vmem:[%s2746_s2 + $0x30] sm:$0xff]  ;;  %v304_v29 = vld [vmem:[%s2747_s1 + $0x18] sm:$0xff] }
  0x30   : > { %324 = vperm.xlu1 %1662, %v310_v16   ;;  %334 = vperm.xlu0 %1661, %v312_v19  }
  0x31   : > { %1447 = vmatmul.mubr.msk.f32.vlgmr.msra.gmra.mrb[0].mxu0 %vm357_vm0, %v301_v17  ;;  %1451 = vmatmul.mubr.msk.f32.vlgmr.msra.gmra.mrb[0].mxu1 %vm357_vm0, %v305_v18 }
  0x32   : > { %452 = vmatprep.mubr.f32.mxu0 %v1915_v7  ;;  %476 = vmatprep.mubr.f32.mxu1 %v1915_v7 }
  0x34   : > { %344 = vperm.xlu1 %1662, %v314_v20   ;;  %339 = vperm.xlu0 %1661, %v313_v23  }
  0x35   : > { %1448 = vmatmul.mubr.msk.f32.gmra.mrb[2].mxu0 %vm357_vm0, %v302_v21  ;;  %1452 = vmatmul.mubr.msk.f32.gmra.mrb[2].mxu1 %vm357_vm0, %v306_v22 }
  0x36   : > { %482 = vmatprep.mubr.f32.mxu1 %v1915_v7  ;;  %458 = vmatprep.mubr.f32.mxu0 %v1915_v7 }
  0x38   : > { %354 = vperm.xlu1 %1662, %v316_v24   ;;  %349 = vperm.xlu0 %1661, %v315_v27  }
  0x39   : > { %1453 = vmatmul.mubr.msk.f32.gmra.mrb[4].mxu1 %vm357_vm0, %v307_v25  ;;  %1449 = vmatmul.mubr.msk.f32.gmra.mrb[4].mxu0 %vm357_vm0, %v303_v26 }
  0x3a   : > { %488 = vmatprep.mubr.f32.mxu1 %v1915_v7  ;;  %464 = vmatprep.mubr.f32.mxu0 %v1915_v7 }
  0x3d   : > { %1454 = vmatmul.mubr.msk.f32.gmra.mrb[6].mxu1 %vm357_vm0, %v308_v28  ;;  %1450 = vmatmul.mubr.msk.f32.gmra.mrb[6].mxu0 %vm357_vm0, %v304_v29 }
  0xab   : > { %v330_v30 = vpop.permute.xlu0 %329  ;;  %v320_v31 = vpop.permute.xlu1 %319 }
  0xaf   : > { %v335_v32 = vpop.permute.xlu0 %334  ;;  %v325_v33 = vpop.permute.xlu1 %324 }
  0xb3   : > { %v340_v34 = vpop.permute.xlu0 %339  ;;  %v345_v39 = vpop.permute.xlu1 %344 }
  0xb7   : > { %v350_v54 = vpop.permute.xlu0 %349  ;;  %v355_v61 = vpop.permute.xlu1 %354 }
 0x104   : > { %v448_v35 = vpop.f32.mrb[0].mxu0  ;;  %v472_v36 = vpop.f32.mrb[0].mxu1 }
 0x105   : > { %v450_v37 = vpop.f32.mrb[1].mxu0  ;;  %v474_v38 = vpop.f32.mrb[1].mxu1  ;;  %v473_v40 = vadd.f32 %v472_v36, %v340_v34  ;;  %v449_v44 = vadd.f32 %v448_v35, %v320_v31 }
 0x106   : > { %v475_v41 = vadd.f32 %v474_v38, %v340_v34  ;;  %v451_v49 = vadd.f32 %v450_v37, %v320_v31 }
 0x108   : > { %v454_v42 = vpop.f32.mrb[2].mxu0  ;;  %v478_v43 = vpop.f32.mrb[2].mxu1 }
 0x109   : > { %v455_v45 = vadd.f32 %v454_v42, %v325_v33  ;;  %v479_v46 = vadd.f32 %v478_v43, %v345_v39  ;;  %v456_v47 = vpop.f32.mrb[3].mxu0  ;;  %v480_v48 = vpop.f32.mrb[3].mxu1 }
 0x10a   : > { %v457_v50 = vadd.f32 %v456_v47, %v325_v33  ;;  %v481_v51 = vadd.f32 %v480_v48, %v345_v39 }
 0x10b   : > { %v495_v52 = vpack.c.bf16 %v455_v45, %v449_v44  ;;  %v548_v53 = vpack.c.bf16 %v479_v46, %v473_v40 }
 0x10c   : > { %v496_v55 = vpack.c.bf16 %v457_v50, %v451_v49  ;;  %v549_v56 = vpack.c.bf16 %v481_v51, %v475_v41  ;;  %v484_v57 = vpop.f32.mrb[4].mxu1  ;;  %v460_v58 = vpop.f32.mrb[4].mxu0 }
 0x10d   : > { %497 = vxpose.xlu0.c.b16.start.end [1/1] (short) %v495_v52, 128  ;;  %v486_v59 = vpop.f32.mrb[5].mxu1  ;;  %v462_v60 = vpop.f32.mrb[5].mxu0  ;;  %v485_v62 = vadd.f32 %v484_v57, %v350_v54  ;;  %v461_v63 = vadd.f32 %v460_v58, %v330_v30 }
 0x10e   : > { %513 = vxpose.xlu1.c.b16.start.end [1/1] (short) %v496_v55, 128  ;;  %v487_v0 = vadd.f32 %v486_v59, %v350_v54  ;;  %v463_v2 = vadd.f32 %v462_v60, %v330_v30 }
 0x110   : > { %v490_v1 = vpop.f32.mrb[6].mxu1  ;;  %v466_v3 = vpop.f32.mrb[6].mxu0 }
 0x111   : > { %v491_v4 = vadd.f32 %v490_v1, %v355_v61  ;;  %v492_v5 = vpop.f32.mrb[7].mxu1  ;;  %v467_v6 = vadd.f32 %v466_v3, %v335_v32  ;;  %v468_v7 = vpop.f32.mrb[7].mxu0 }
 0x112   : > { %v493_v8 = vadd.f32 %v492_v5, %v355_v61  ;;  %v469_v9 = vadd.f32 %v468_v7, %v335_v32 }
 0x113   : > { %v598_v10 = vpack.c.bf16 %v491_v4, %v485_v62  ;;  %v546_v11 = vpack.c.bf16 %v467_v6, %v461_v63 }
 0x114   : > { %v599_v12 = vpack.c.bf16 %v493_v8, %v487_v0  ;;  %v547_v13 = vpack.c.bf16 %v469_v9, %v463_v2 }
 0x115   : > { %600 = vst [vmem:[#allocation2] sm:$0xff] %v598_v10 }
 0x116   : > { %601 = vst [vmem:[#allocation2 + $0x8] sm:$0xff] %v599_v12 }
 0x12a   : > { %550 = vxpose.xlu0.c.b16.start [1/2] (short) %v546_v11, 128 }
 0x12b   : > { %566 = vxpose.xlu1.c.b16.start [1/2] (short) %v547_v13, 128 }
 0x12e   : > { %551 = vxpose.xlu0.c.b16.end [2/2] (short) %v548_v53, 128 }
 0x12f   : > { %567 = vxpose.xlu1.c.b16.end [2/2] (short) %v549_v56, 128 }
 0x173   : > { %v505_v14 = vpop.trf.xlu0 }
 0x174   : > { %v521_v15 = vpop.trf.xlu1  ;;  %530 = vst.msk [vmem:[#allocation3] sm:$0xff] %vm529_vm1, %v505_v14 }
 0x175   : > { %538 = vst.msk [vmem:[#allocation3 + $0x40] sm:$0xff] %vm529_vm1, %v521_v15 }
 0x177   : > { %v506_v16 = vpop.trf.xlu0 }
 0x178   : > { %v522_v17 = vpop.trf.xlu1  ;;  %531 = vst.msk [vmem:[#allocation3 + $0x8] sm:$0xff] %vm529_vm1, %v506_v16 }
 0x179   : > { %539 = vst.msk [vmem:[#allocation3 + $0x48] sm:$0xff] %vm529_vm1, %v522_v17 }
 0x17b   : > { %v507_v18 = vpop.trf.xlu0 }
 0x17c   : > { %v523_v19 = vpop.trf.xlu1  ;;  %532 = vst.msk [vmem:[#allocation3 + $0x10] sm:$0xff] %vm529_vm1, %v507_v18 }
 0x17d   : > { %540 = vst.msk [vmem:[#allocation3 + $0x50] sm:$0xff] %vm529_vm1, %v523_v19 }
 0x17f   : > { %v508_v20 = vpop.trf.xlu0 }
 0x180   : > { %v524_v21 = vpop.trf.xlu1  ;;  %533 = vst.msk [vmem:[#allocation3 + $0x18] sm:$0xff] %vm529_vm1, %v508_v20 }
 0x181   : > { %541 = vst.msk [vmem:[#allocation3 + $0x58] sm:$0xff] %vm529_vm1, %v524_v21 }
 0x183   : > { %v509_v22 = vpop.trf.xlu0 }
 0x184   : > { %v525_v23 = vpop.trf.xlu1  ;;  %534 = vst.msk [vmem:[#allocation3 + $0x20] sm:$0xff] %vm529_vm1, %v509_v22 }
 0x185   : > { %542 = vst.msk [vmem:[#allocation3 + $0x60] sm:$0xff] %vm529_vm1, %v525_v23 }
 0x187   : > { %v510_v24 = vpop.trf.xlu0 }
 0x188   : > { %v526_v25 = vpop.trf.xlu1  ;;  %535 = vst.msk [vmem:[#allocation3 + $0x28] sm:$0xff] %vm529_vm1, %v510_v24 }
 0x189   : > { %543 = vst.msk [vmem:[#allocation3 + $0x68] sm:$0xff] %vm529_vm1, %v526_v25 }
 0x18b   : > { %v511_v26 = vpop.trf.xlu0 }
 0x18c   : > { %v527_v27 = vpop.trf.xlu1  ;;  %536 = vst.msk [vmem:[#allocation3 + $0x30] sm:$0xff] %vm529_vm1, %v511_v26 }
 0x18d   : > { %544 = vst.msk [vmem:[#allocation3 + $0x70] sm:$0xff] %vm529_vm1, %v527_v27 }
 0x18f   : > { %v512_v28 = vpop.trf.xlu0 }
 0x190   : > { %v528_v29 = vpop.trf.xlu1  ;;  %537 = vst.msk [vmem:[#allocation3 + $0x38] sm:$0xff] %vm529_vm1, %v512_v28 }
 0x191   : > { %545 = vst.msk [vmem:[#allocation3 + $0x78] sm:$0xff] %vm529_vm1, %v528_v29 }
 0x193   : > { %v558_v30 = vpop.trf.xlu0 }
 0x194   : > { %v574_v31 = vpop.trf.xlu1  ;;  %582 = vst.msk [vmem:[#allocation4] sm:$0xff] %vm357_vm0, %v558_v30 }
 0x195   : > { %590 = vst.msk [vmem:[#allocation4 + $0x40] sm:$0xff] %vm357_vm0, %v574_v31 }
 0x197   : > { %v559_v32 = vpop.trf.xlu0 }
 0x198   : > { %v575_v33 = vpop.trf.xlu1  ;;  %583 = vst.msk [vmem:[#allocation4 + $0x8] sm:$0xff] %vm357_vm0, %v559_v32 }
 0x199   : > { %591 = vst.msk [vmem:[#allocation4 + $0x48] sm:$0xff] %vm357_vm0, %v575_v33 }
 0x19b   : > { %v560_v34 = vpop.trf.xlu0 }
 0x19c   : > { %v576_v35 = vpop.trf.xlu1  ;;  %584 = vst.msk [vmem:[#allocation4 + $0x10] sm:$0xff] %vm357_vm0, %v560_v34 }
 0x19d   : > { %592 = vst.msk [vmem:[#allocation4 + $0x50] sm:$0xff] %vm357_vm0, %v576_v35 }
 0x19f   : > { %v561_v36 = vpop.trf.xlu0 }
 0x1a0   : > { %v577_v37 = vpop.trf.xlu1  ;;  %585 = vst.msk [vmem:[#allocation4 + $0x18] sm:$0xff] %vm357_vm0, %v561_v36 }
 0x1a1   : > { %593 = vst.msk [vmem:[#allocation4 + $0x58] sm:$0xff] %vm357_vm0, %v577_v37 }
 0x1a3   : > { %v562_v38 = vpop.trf.xlu0 }
 0x1a4   : > { %v578_v39 = vpop.trf.xlu1  ;;  %586 = vst.msk [vmem:[#allocation4 + $0x20] sm:$0xff] %vm357_vm0, %v562_v38 }
 0x1a5   : > { %594 = vst.msk [vmem:[#allocation4 + $0x60] sm:$0xff] %vm357_vm0, %v578_v39 }
 0x1a7   : > { %v563_v40 = vpop.trf.xlu0 }
 0x1a8   : > { %v579_v41 = vpop.trf.xlu1  ;;  %587 = vst.msk [vmem:[#allocation4 + $0x28] sm:$0xff] %vm357_vm0, %v563_v40 }
 0x1a9   : > { %595 = vst.msk [vmem:[#allocation4 + $0x68] sm:$0xff] %vm357_vm0, %v579_v41 }
 0x1ab   : > { %v564_v42 = vpop.trf.xlu0 }
 0x1ac   : > { %v580_v43 = vpop.trf.xlu1  ;;  %588 = vst.msk [vmem:[#allocation4 + $0x30] sm:$0xff] %vm357_vm0, %v564_v42 }
 0x1ad   : > { %596 = vst.msk [vmem:[#allocation4 + $0x70] sm:$0xff] %vm357_vm0, %v580_v43 }
 0x1af   : > { %v565_v44 = vpop.trf.xlu0 }
 0x1b0   : > { %v581_v45 = vpop.trf.xlu1  ;;  %589 = vst.msk [vmem:[#allocation4 + $0x38] sm:$0xff] %vm357_vm0, %v565_v44 }
 0x1b1   : > { %597 = vst.msk [vmem:[#allocation4 + $0x78] sm:$0xff] %vm357_vm0, %v581_v45 }
 0x1b2 PF: > { %v616_v46 = vld [vmem:[#allocation2 + $0x8] sm:$0xff]  ;;  %v615_v47 = vld [vmem:[#allocation2] sm:$0xff]  ;;  %s1455_s0 = sshll.u32 %s1897_s26, 7  ;;  %v1917_v48 = vmov 0   ;;  %vm617_vm2 = vcmask 130048   ;;  %v987_v57 = vld [vmem:[#allocation4 + $0x40] sm:$0xff] }
 0x1b3   : > { %642 = vmatprep.subr.bf16.mxu0 %v616_v46  ;;  %674 = vmatprep.mubr.bf16.mxu0 %v1917_v48  ;;  %s603_s3 = sshra.s32 %s1455_s0, 4  ;;  %v979_v58 = vld [vmem:[#allocation4] sm:$0xff]  ;;  %v988_v59 = vld [vmem:[#allocation4 + $0x48] sm:$0xff]  ;;  %v989_v61 = vld [vmem:[#allocation4 + $0x50] sm:$0xff]  ;;  %s1140_s7 = sld [smem:[#allocation5]] }
 0x1b4   : > { %643 = vmatpush1.bf16.msra.mxu0 %v615_v47  ;;  %s1456_s9 = sshll.u32 %s603_s3, 3  ;;  %1557 = vmatprep.subr.bf16.mxu1 %v987_v57  ;;  %v980_v60 = vld [vmem:[#allocation4 + $0x8] sm:$0xff]  ;;  %v981_v62 = vld [vmem:[#allocation4 + $0x10] sm:$0xff]  ;;  %v990_v63 = vld [vmem:[#allocation4 + $0x58] sm:$0xff]  ;;  %s1146_s18 = sshra.s32 %s1455_s0, 7 }
 0x1b5   : > { %s606_s22 = scalar_lea.vmem [#allocation3], %s1456_s9  ;;  %1481 = vmatprep.subr.bf16.mxu0 %v987_v57  ;;  %1565 = vmatpush3.bf16.msra.mxu1 %v979_v58  ;;  %v982_v24 = vld [vmem:[#allocation4 + $0x18] sm:$0xff]  ;;  %v991_v26 = vld [vmem:[#allocation4 + $0x60] sm:$0xff]  ;;  %v992_v33 = vld [vmem:[#allocation4 + $0x68] sm:$0xff]  ;;  %s1465_s19 = sshll.u32 %s1146_s18, 3 }
 0x1b6   : > { %v607_v49 = vld [vmem:[%s606_s22] sm:$0xff]  ;;  %v608_v50 = vld [vmem:[%s606_s22 + $0x8] sm:$0xff]  ;;  %v609_v51 = vld [vmem:[%s606_s22 + $0x10] sm:$0xff]  ;;  %1558 = vmatprep.subr.bf16.mxu1 %v988_v59  ;;  %s2567_s20 = scalar_lea.vmem %s2048_s10, %s1465_s19  ;;  %s1469_s21 = sshll.u32 %s1901_s27, 3 }
 0x1b7   : > { %1457 = vmatmul.mubr.msk.bf16.vlgmr.msra.gmra.mrb[0].mxu0 %vm617_vm2, %v607_v49  ;;  %v610_v52 = vld [vmem:[%s606_s22 + $0x18] sm:$0xff]  ;;  %v611_v53 = vld [vmem:[%s606_s22 + $0x20] sm:$0xff]  ;;  %v612_v54 = vld [vmem:[%s606_s22 + $0x28] sm:$0xff]  ;;  %s2748_s0 = sadd.s32 4294967295, %s1913_s30   ;;  %s2578_s10 = sadd.s32 %s1897_s26, %s1469_s21 }
 0x1b8   : > { %684 = vmatprep.mubr.bf16.mxu0 %v1917_v48  ;;  %v613_v55 = vld [vmem:[%s606_s22 + $0x30] sm:$0xff]  ;;  %v614_v56 = vld [vmem:[%s606_s22 + $0x38] sm:$0xff]  ;;  %1482 = vmatpush3.bf16.msra.mxu0 %v979_v58  ;;  %v993_v36 = vld [vmem:[#allocation4 + $0x70] sm:$0xff]  ;;  %s2575_s3 = sand.u32 1, %s2748_s0   ;;  %s1480_s9 = sshll.u32 %s1897_s26, 5 }
 0x1b9   : > { %1483 = vmatprep.subr.bf16.mxu0 %v988_v59  ;;  %1566 = vmatpush3.bf16.msra.mxu1 %v980_v60  ;;  %v983_v28 = vld [vmem:[#allocation4 + $0x20] sm:$0xff]  ;;  %v984_v34 = vld [vmem:[#allocation4 + $0x28] sm:$0xff]  ;;  %v985_v38 = vld [vmem:[#allocation4 + $0x30] sm:$0xff]  ;;  %s1475_s22 = sshll.u32 %s1901_s27, 6  ;;  %s1272_s19 = sshll.u32 %s2052_s14, 4  ;;  %s2596_s19 = int_to_ptr.vmem [resolvable:$true] %s1272_s19 }
 0x1ba   : > { %1559 = vmatprep.subr.bf16.mxu1 %v989_v61  ;;  %v994_v43 = vld [vmem:[#allocation4 + $0x78] sm:$0xff]  ;;  %s1288_s18 = sadd.s32 %s1480_s9, %s1475_s22  ;;  %s1291_s21 = sshll.u32 %s2054_s15, 4  ;;  %s2600_s21 = int_to_ptr.vmem [resolvable:$true] %s1291_s21 }
 0x1bb   : > { %v986_v44 = vld [vmem:[#allocation4 + $0x38] sm:$0xff]  ;;  %s1476_s1 = sshll.u32 %s1288_s18, 7  ;;  %s1236_s26 = scalar_lea.sflag [#allocation9], %s2575_s3 }
 0x1bc   : > { %1484 = vmatpush3.bf16.msra.mxu0 %v980_v60  ;;  %s2605_s22 = scalar_lea.hbm %s2731_s6, %s1476_s1  ;;  %s1759_s2 = scalar_lea.vmem %s2596_s19, 512 }
 0x1bd   : > { %1485 = vmatprep.subr.bf16.mxu0 %v989_v61  ;;  %1567 = vmatpush3.bf16.msra.mxu1 %v981_v62  ;;  %p1760_p0 = scmp.ne.s32.totalorder %s2596_s19, %s1759_s2  ;;  %s1918_s8 = smov [#allocation8]  }
 0x1be   : > { %1560 = vmatprep.subr.bf16.mxu1 %v990_v63  ;;  %s1763_s29 = sshll.u32 %s1918_s8, 4  ;;  %s1764_s29 = int_to_ptr.vmem [resolvable:$false] %s1763_s29 }
 0x1bf   : > { %1458 = vmatmul.mubr.msk.bf16.gmra.mrb[4].mxu0 %vm617_vm2, %v608_v50  ;;  %p1761_p1 = pnand %p1760_p0, %p2016_p3  ;;  %s1765_s1 = scalar_lea.vmem %s1764_s29, 1024 }
 0x1c0   : > { %694 = vmatprep.mubr.bf16.mxu0 %v1917_v48  ;;  %1486 = vmatpush3.bf16.msra.mxu0 %v981_v62  ;;  %p1766_p4 = scmp.lt.s32.totalorder %s2596_s19, %s1764_s29  ;;  %p1767_p5 = scmp.lt.s32.totalorder %s1765_s1, %s1759_s2 }
 0x1c1   : > { %1487 = vmatprep.subr.bf16.mxu0 %v990_v63  ;;  %1568 = vmatpush3.bf16.msra.mxu1 %v982_v24  ;;  %p1762_p2 = pneg %p1761_p1 }
 0x1c2   : > { %1561 = vmatprep.subr.bf16.mxu1 %v991_v26  ;;  %p1768_p6 = por %p1767_p5, %p1766_p4 }
 0x1c4   : > { %1488 = vmatpush3.bf16.msra.mxu0 %v982_v24  ;;  %p1769_p7 = pnand %p1768_p6, %p1762_p2 }
 0x1c5   : > { %1489 = vmatprep.subr.bf16.mxu0 %v991_v26  ;;  %1569 = vmatpush3.bf16.msra.mxu1 %v983_v28 }
 0x1c6   : > { %1562 = vmatprep.subr.bf16.mxu1 %v992_v33 }
 0x1c7   : > { %1459 = vmatmul.mubr.msk.bf16.gmra.mrb[8].mxu0 %vm617_vm2, %v609_v51 }
 0x1c8   : > { %704 = vmatprep.mubr.bf16.mxu0 %v1917_v48  ;;  %1490 = vmatpush3.bf16.msra.mxu0 %v983_v28 }
 0x1c9   : > { %1491 = vmatprep.subr.bf16.mxu0 %v992_v33  ;;  %1570 = vmatpush3.bf16.msra.mxu1 %v984_v34 }
 0x1ca   : > { %1563 = vmatprep.subr.bf16.mxu1 %v993_v36 }
 0x1cc   : > { %1492 = vmatpush3.bf16.msra.mxu0 %v984_v34 }
 0x1cd   : > { %1493 = vmatprep.subr.bf16.mxu0 %v993_v36  ;;  %1571 = vmatpush3.bf16.msra.mxu1 %v985_v38 }
 0x1ce   : > { %1564 = vmatprep.subr.bf16.mxu1 %v994_v43 }
 0x1cf   : > { %1460 = vmatmul.mubr.msk.bf16.gmra.mrb[12].mxu0 %vm617_vm2, %v610_v52 }
 0x1d0   : > { %714 = vmatprep.mubr.bf16.mxu0 %v1917_v48  ;;  %1494 = vmatpush3.bf16.msra.mxu0 %v985_v38 }
 0x1d1   : > { %1495 = vmatprep.subr.bf16.mxu0 %v994_v43  ;;  %1572 = vmatpush3.bf16.msra.mxu1 %v986_v44 }
 0x1d4   : > { %1496 = vmatpush3.bf16.msra.mxu0 %v986_v44 }
 0x1d7   : > { %1461 = vmatmul.mubr.msk.bf16.gmra.mrb[16].mxu0 %vm617_vm2, %v611_v53 }
 0x1d8   : > { %724 = vmatprep.mubr.bf16.mxu0 %v1917_v48 }
 0x1df   : > { %1462 = vmatmul.mubr.msk.bf16.gmra.mrb[20].mxu0 %vm617_vm2, %v612_v54 }
 0x1e0   : > { %734 = vmatprep.mubr.bf16.mxu0 %v1917_v48 }
 0x1e7   : > { %1463 = vmatmul.mubr.msk.bf16.gmra.mrb[24].mxu0 %vm617_vm2, %v613_v55 }
 0x1e8   : > { %744 = vmatprep.mubr.bf16.mxu0 %v1917_v48 }
 0x1ef   : > { %1464 = vmatmul.mubr.msk.bf16.gmra.mrb[28].mxu0 %vm617_vm2, %v614_v56 }
 0x28a   : > { %v2164_v0 = vpop.f32.mrb[0].mxu0 }
 0x28b   : > { %v2166_v1 = vpop.f32.mrb[1].mxu0 }
 0x28c   : > { %v2168_v2 = vpop.f32.mrb[2].mxu0  ;;  %v755_v3 = vmax.f32 %v2164_v0, %v2166_v1 }
 0x28d   : > { %v2172_v4 = vpop.f32.mrb[3].mxu0 }
 0x28e   : > { %v758_v5 = vmax.f32 %v2168_v2, %v2172_v4 }
 0x292   : > { %v2176_v6 = vpop.f32.mrb[4].mxu0 }
 0x293   : > { %v2178_v7 = vpop.f32.mrb[5].mxu0 }
 0x294   : > { %v2180_v8 = vpop.f32.mrb[6].mxu0  ;;  %v761_v9 = vmax.f32 %v2176_v6, %v2178_v7 }
 0x295   : > { %v2184_v10 = vpop.f32.mrb[7].mxu0 }
 0x296   : > { %762 = vmax.xlane.f32.xlu0 %v761_v9  ;;  %v764_v11 = vmax.f32 %v2180_v8, %v2184_v10 }
 0x29a   : > { %765 = vmax.xlane.f32.xlu0 %v764_v11  ;;  %v2188_v12 = vpop.f32.mrb[8].mxu0 }
 0x29b   : > { %v2190_v13 = vpop.f32.mrb[9].mxu0 }
 0x29c   : > { %v2192_v14 = vpop.f32.mrb[10].mxu0  ;;  %v767_v15 = vmax.f32 %v2188_v12, %v2190_v13 }
 0x29d   : > { %v2196_v16 = vpop.f32.mrb[11].mxu0 }
 0x29e   : > { %768 = vmax.xlane.f32.xlu1 %v767_v15  ;;  %v770_v17 = vmax.f32 %v2192_v14, %v2196_v16 }
 0x2a2   : > { %771 = vmax.xlane.f32.xlu1 %v770_v17  ;;  %v2200_v18 = vpop.f32.mrb[12].mxu0 }
 0x2a3   : > { %v2202_v19 = vpop.f32.mrb[13].mxu0 }
 0x2a4   : > { %v2204_v20 = vpop.f32.mrb[14].mxu0  ;;  %v773_v21 = vmax.f32 %v2200_v18, %v2202_v19 }
 0x2a5   : > { %v2208_v22 = vpop.f32.mrb[15].mxu0 }
 0x2a6   : > { %774 = vmax.xlane.f32.xlu0 %v773_v21  ;;  %v776_v23 = vmax.f32 %v2204_v20, %v2208_v22 }
 0x2a8   : > { %777 = vmax.xlane.f32.xlu1 %v776_v23 }
 0x2aa   : > { %756 = vmax.xlane.f32.xlu0 %v755_v3  ;;  %v2212_v25 = vpop.f32.mrb[16].mxu0 }
 0x2ab   : > { %v2214_v27 = vpop.f32.mrb[17].mxu0 }
 0x2ac   : > { %759 = vmax.xlane.f32.xlu1 %v758_v5  ;;  %v2216_v29 = vpop.f32.mrb[18].mxu0  ;;  %v779_v30 = vmax.f32 %v2212_v25, %v2214_v27 }
 0x2ad   : > { %v2220_v31 = vpop.f32.mrb[19].mxu0 }
 0x2ae   : > { %780 = vmax.xlane.f32.xlu0 %v779_v30  ;;  %v782_v32 = vmax.f32 %v2216_v29, %v2220_v31 }
 0x2b0   : > { %783 = vmax.xlane.f32.xlu1 %v782_v32 }
 0x2b2   : > { %v2224_v35 = vpop.f32.mrb[20].mxu0 }
 0x2b3   : > { %v2226_v37 = vpop.f32.mrb[21].mxu0 }
 0x2b4   : > { %v2228_v39 = vpop.f32.mrb[22].mxu0  ;;  %v785_v40 = vmax.f32 %v2224_v35, %v2226_v37 }
 0x2b5   : > { %v2232_v41 = vpop.f32.mrb[23].mxu0 }
 0x2b6   : > { %786 = vmax.xlane.f32.xlu0 %v785_v40  ;;  %v788_v42 = vmax.f32 %v2228_v39, %v2232_v41 }
 0x2b8   : > { %789 = vmax.xlane.f32.xlu1 %v788_v42 }
 0x2ba   : > { %v2236_v45 = vpop.f32.mrb[24].mxu0 }
 0x2bb   : > { %v2238_v46 = vpop.f32.mrb[25].mxu0 }
 0x2bc   : > { %v2240_v47 = vpop.f32.mrb[26].mxu0  ;;  %v791_v48 = vmax.f32 %v2236_v45, %v2238_v46 }
 0x2bd   : > { %v2244_v49 = vpop.f32.mrb[27].mxu0 }
 0x2be   : > { %792 = vmax.xlane.f32.xlu0 %v791_v48  ;;  %v794_v50 = vmax.f32 %v2240_v47, %v2244_v49 }
 0x2c0   : > { %795 = vmax.xlane.f32.xlu1 %v794_v50 }
 0x2c2   : > { %v2248_v51 = vpop.f32.mrb[28].mxu0 }
 0x2c3   : > { %v2250_v52 = vpop.f32.mrb[29].mxu0 }
 0x2c4   : > { %v2252_v53 = vpop.f32.mrb[30].mxu0  ;;  %v797_v54 = vmax.f32 %v2248_v51, %v2250_v52 }
 0x2c5   : > { %v2256_v55 = vpop.f32.mrb[31].mxu0 }
 0x2c6   : > { %798 = vmax.xlane.f32.xlu0 %v797_v54  ;;  %v800_v56 = vmax.f32 %v2252_v53, %v2256_v55 }
 0x2c8   : > { %801 = vmax.xlane.f32.xlu1 %v800_v56 }
 0x323   : > { %v763_v57 = vpop.xlane.xlu0 %762 }
 0x324   : > { %v807_v58 = vsub.f32 %v2176_v6, %v763_v57  ;;  %v808_v59 = vsub.f32 %v2178_v7, %v763_v57 }
 0x326   : > { %v843_v60 = vmul.f32 1.442695, %v807_v58  ;;  %v845_v3 = vmul.f32 1.442695, %v808_v59 }
 0x327   : > { %v766_v61 = vpop.xlane.xlu0 %765 }
 0x328   : > { %v809_v62 = vsub.f32 %v2180_v8, %v766_v61  ;;  %v810_v63 = vsub.f32 %v2184_v10, %v766_v61  ;;  %1663 = vpow2.f32 %v843_v60 }
 0x32a   : > { %v847_v5 = vmul.f32 1.442695, %v809_v62  ;;  %v849_v9 = vmul.f32 1.442695, %v810_v63 }
 0x32b   : > { %v769_v11 = vpop.xlane.xlu1 %768 }
 0x32c   : > { %1665 = vpow2.f32 %v847_v5  ;;  %v811_v15 = vsub.f32 %v2188_v12, %v769_v11  ;;  %v812_v17 = vsub.f32 %v2190_v13, %v769_v11 }
 0x32d   : > { %1667 = vpow2.f32 %v849_v9 }
 0x32e   : > { %1669 = vpow2.f32 %v845_v3  ;;  %v851_v6 = vmul.f32 1.442695, %v811_v15  ;;  %v853_v7 = vmul.f32 1.442695, %v812_v17 }
 0x32f   : > { %v772_v21 = vpop.xlane.xlu1 %771 }
 0x330   : > { %v813_v23 = vsub.f32 %v2192_v14, %v772_v21  ;;  %v814_v8 = vsub.f32 %v2196_v16, %v772_v21  ;;  %1671 = vpow2.f32 %v851_v6 }
 0x331   : > { %1673 = vpow2.f32 %v853_v7 }
 0x332   : > { %v855_v10 = vmul.f32 1.442695, %v813_v23  ;;  %v857_v24 = vmul.f32 1.442695, %v814_v8  ;;  %v2270_v13 = vpop.eup %1663 }
 0x333   : > { %v775_v26 = vpop.xlane.xlu0 %774 }
 0x334   : > { %1675 = vpow2.f32 %v855_v10  ;;  %v815_v28 = vsub.f32 %v2200_v18, %v775_v26  ;;  %v816_v12 = vsub.f32 %v2202_v19, %v775_v26 }
 0x335   : > { %1677 = vpow2.f32 %v857_v24  ;;  %v778_v30 = vpop.xlane.xlu1 %777 }
 0x336   : > { %v2272_v32 = vpop.eup %1665  ;;  %v859_v33 = vmul.f32 1.442695, %v815_v28  ;;  %v861_v14 = vmul.f32 1.442695, %v816_v12  ;;  %v817_v16 = vsub.f32 %v2204_v20, %v778_v30  ;;  %v818_v34 = vsub.f32 %v2208_v22, %v778_v30 }
 0x337   : > { %v2276_v36 = vpop.eup %1667  ;;  %v757_v38 = vpop.xlane.xlu0 %756  ;;  %v965_v18 = vpack.c.bf16 %v2272_v32, %v2270_v13 }
 0x338   : > { %v2280_v40 = vpop.eup %1669  ;;  %1679 = vpow2.f32 %v859_v33  ;;  %v863_v19 = vmul.f32 1.442695, %v817_v16  ;;  %v865_v42 = vmul.f32 1.442695, %v818_v34  ;;  %v803_v43 = vsub.f32 %v2164_v0, %v757_v38 }
 0x339   : > { %1681 = vpow2.f32 %v861_v14  ;;  %v804_v44 = vsub.f32 %v2166_v1, %v757_v38  ;;  %v966_v20 = vpack.c.bf16 %v2276_v36, %v2280_v40  ;;  %v760_v22 = vpop.xlane.xlu1 %759 }
 0x33a   : > { %1683 = vpow2.f32 %v863_v19  ;;  %v835_v48 = vmul.f32 1.442695, %v803_v43  ;;  %v805_v50 = vsub.f32 %v2168_v2, %v760_v22  ;;  %v806_v54 = vsub.f32 %v2172_v4, %v760_v22  ;;  %v2288_v58 = vpop.eup %1671 }
 0x33b   : > { %1685 = vpow2.f32 %v865_v42  ;;  %v837_v56 = vmul.f32 1.442695, %v804_v44  ;;  %1035 = vmatprep.mubr.bf16.mxu1 %v966_v20  ;;  %v781_v57 = vpop.xlane.xlu0 %780  ;;  %v2290_v1 = vpop.eup %1673  ;;  %v905_v44 = vadd.f32 %v2280_v40, %v2270_v13 }
 0x33c   : > { %1687 = vpow2.f32 %v835_v48  ;;  %v839_v0 = vmul.f32 1.442695, %v805_v50  ;;  %v841_v59 = vmul.f32 1.442695, %v806_v54  ;;  %1036 = vmatmul.mubr.bf16.vlgmr.msra.gmra.mrb[0].mxu1 %v965_v18  ;;  %v820_v60 = vsub.f32 %v2214_v27, %v781_v57 }
 0x33d   : > { %1689 = vpow2.f32 %v837_v56  ;;  %v784_v61 = vpop.xlane.xlu1 %783  ;;  %v819_v3 = vsub.f32 %v2212_v25, %v781_v57 }
 0x33e   : > { %v2293_v62 = vpop.eup %1675  ;;  %1691 = vpow2.f32 %v839_v0  ;;  %v821_v2 = vsub.f32 %v2216_v29, %v784_v61  ;;  %v822_v4 = vsub.f32 %v2220_v31, %v784_v61  ;;  %v869_v5 = vmul.f32 1.442695, %v820_v60 }
 0x33f   : > { %v2297_v63 = vpop.eup %1677  ;;  %1693 = vpow2.f32 %v841_v59  ;;  %v967_v27 = vpack.c.bf16 %v2293_v62, %v2288_v58  ;;  %v867_v31 = vmul.f32 1.442695, %v819_v3  ;;  %v908_v0 = vadd.f32 %v2276_v36, %v2272_v32 }
 0x340   : > { %v873_v9 = vmul.f32 1.442695, %v822_v4  ;;  %v968_v11 = vpack.c.bf16 %v2297_v63, %v2290_v1  ;;  %v871_v15 = vmul.f32 1.442695, %v821_v2  ;;  %v911_v60 = vadd.f32 %v2290_v1, %v2288_v58 }
 0x341   : > { %v914_v4 = vadd.f32 %v2297_v63, %v2293_v62 }
 0x342   : > { %v2304_v17 = vpop.eup %1679  ;;  %1043 = vmatprep.mubr.bf16.mxu1 %v968_v11  ;;  %1695 = vpow2.f32 %v873_v9 }
 0x343   : > { %v2306_v29 = vpop.eup %1681  ;;  %v787_v6 = vpop.xlane.xlu0 %786  ;;  %1697 = vpow2.f32 %v869_v5 }
 0x344   : > { %v2308_v7 = vpop.eup %1683  ;;  %1044 = vmatmul.mubr.bf16.gmra.mrb[4].mxu1 %v967_v27  ;;  %v824_v25 = vsub.f32 %v2226_v37, %v787_v6  ;;  %1699 = vpow2.f32 %v871_v15  ;;  %v823_v28 = vsub.f32 %v2224_v35, %v787_v6  ;;  %v917_v9 = vadd.f32 %v2306_v29, %v2304_v17 }
 0x345   : > { %v2311_v21 = vpop.eup %1685  ;;  %v790_v23 = vpop.xlane.xlu1 %789  ;;  %1701 = vpow2.f32 %v867_v31  ;;  %v969_v35 = vpack.c.bf16 %v2308_v7, %v2304_v17 }
 0x346   : > { %v2313_v8 = vpop.eup %1687  ;;  %v825_v10 = vsub.f32 %v2228_v39, %v790_v23  ;;  %v826_v24 = vsub.f32 %v2232_v41, %v790_v23  ;;  %v970_v12 = vpack.c.bf16 %v2311_v21, %v2306_v29  ;;  %v877_v37 = vmul.f32 1.442695, %v824_v25 }
 0x347   : > { %v2317_v26 = vpop.eup %1689  ;;  %v875_v18 = vmul.f32 1.442695, %v823_v28 }
 0x348   : > { %v2322_v30 = vpop.eup %1691  ;;  %v881_v33 = vmul.f32 1.442695, %v826_v24  ;;  %v899_v14 = vadd.f32 %v2317_v26, %v2313_v8  ;;  %v879_v39 = vmul.f32 1.442695, %v825_v10  ;;  %1051 = vmatprep.mubr.bf16.mxu1 %v970_v12  ;;  %v920_v10 = vadd.f32 %v2311_v21, %v2308_v7 }
 0x349   : > { %v2326_v16 = vpop.eup %1693  ;;  %v963_v41 = vpack.c.bf16 %v2322_v30, %v2313_v8 }
 0x34a   : > { %900 = vadd.xlane.f32.xlu0 %v899_v14  ;;  %v964_v34 = vpack.c.bf16 %v2326_v16, %v2317_v26  ;;  %v902_v38 = vadd.f32 %v2326_v16, %v2322_v30  ;;  %1703 = vpow2.f32 %v881_v33 }
 0x34b   : > { %v793_v19 = vpop.xlane.xlu0 %792  ;;  %1705 = vpow2.f32 %v877_v37 }
 0x34c   : > { %1052 = vmatmul.mubr.bf16.gmra.mrb[8].mxu1 %v969_v35  ;;  %1027 = vmatprep.mubr.bf16.mxu0 %v964_v34  ;;  %v827_v42 = vsub.f32 %v2236_v45, %v793_v19  ;;  %v828_v43 = vsub.f32 %v2238_v46, %v793_v19  ;;  %v2340_v20 = vpop.eup %1695  ;;  %1707 = vpow2.f32 %v879_v39 }
 0x34d   : > { %903 = vadd.xlane.f32.xlu1 %v902_v38  ;;  %1028 = vmatmul.mubr.bf16.vlgmr.msra.gmra.mrb[32].mxu0 %v963_v41  ;;  %v796_v22 = vpop.xlane.xlu1 %795  ;;  %v2342_v48 = vpop.eup %1697  ;;  %1709 = vpow2.f32 %v875_v18 }
 0x34e   : > { %v883_v50 = vmul.f32 1.442695, %v827_v42  ;;  %v885_v54 = vmul.f32 1.442695, %v828_v43  ;;  %v829_v56 = vsub.f32 %v2240_v47, %v796_v22  ;;  %v830_v57 = vsub.f32 %v2244_v49, %v796_v22  ;;  %906 = vadd.xlane.f32.xlu0 %v905_v44  ;;  %v2346_v45 = vpop.eup %1699 }
 0x34f   : > { %v972_v46 = vpack.c.bf16 %v2340_v20, %v2342_v48  ;;  %v2354_v61 = vpop.eup %1701  ;;  %v926_v33 = vadd.f32 %v2346_v45, %v2340_v20 }
 0x350   : > { %v889_v59 = vmul.f32 1.442695, %v830_v57  ;;  %1711 = vpow2.f32 %v883_v50  ;;  %v887_v47 = vmul.f32 1.442695, %v829_v56  ;;  %v971_v49 = vpack.c.bf16 %v2346_v45, %v2354_v61 }
 0x351   : > { %1059 = vmatprep.mubr.bf16.mxu1 %v972_v46  ;;  %909 = vadd.xlane.f32.xlu1 %v908_v0  ;;  %1713 = vpow2.f32 %v885_v54  ;;  %v923_v12 = vadd.f32 %v2354_v61, %v2342_v48 }
 0x352   : > { %912 = vadd.xlane.f32.xlu0 %v911_v60  ;;  %1715 = vpow2.f32 %v889_v59 }
 0x353   : > { %v799_v2 = vpop.xlane.xlu0 %798  ;;  %1717 = vpow2.f32 %v887_v47 }
 0x354   : > { %1060 = vmatmul.mubr.bf16.gmra.mrb[12].mxu1 %v971_v49  ;;  %v831_v3 = vsub.f32 %v2248_v51, %v799_v2  ;;  %v832_v5 = vsub.f32 %v2250_v52, %v799_v2  ;;  %v2364_v11 = vpop.eup %1703 }
 0x355   : > { %915 = vadd.xlane.f32.xlu1 %v914_v4  ;;  %v802_v27 = vpop.xlane.xlu1 %801  ;;  %v2366_v15 = vpop.eup %1705 }
 0x356   : > { %v891_v31 = vmul.f32 1.442695, %v831_v3  ;;  %v893_v6 = vmul.f32 1.442695, %v832_v5  ;;  %918 = vadd.xlane.f32.xlu0 %v917_v9  ;;  %v833_v25 = vsub.f32 %v2252_v53, %v802_v27  ;;  %v834_v23 = vsub.f32 %v2256_v55, %v802_v27  ;;  %v2370_v51 = vpop.eup %1707 }
 0x357   : > { %v974_v52 = vpack.c.bf16 %v2364_v11, %v2366_v15  ;;  %v2378_v37 = vpop.eup %1709  ;;  %v932_v38 = vadd.f32 %v2370_v51, %v2364_v11 }
 0x358   : > { %1719 = vpow2.f32 %v891_v31  ;;  %v895_v24 = vmul.f32 1.442695, %v833_v25  ;;  %v897_v28 = vmul.f32 1.442695, %v834_v23  ;;  %v973_v53 = vpack.c.bf16 %v2370_v51, %v2378_v37 }
 0x359   : > { %1721 = vpow2.f32 %v893_v6  ;;  %1067 = vmatprep.mubr.bf16.mxu1 %v974_v52  ;;  %921 = vadd.xlane.f32.xlu1 %v920_v10  ;;  %v929_v39 = vadd.f32 %v2378_v37, %v2366_v15 }
 0x35a   : > { %1723 = vpow2.f32 %v895_v24  ;;  %924 = vadd.xlane.f32.xlu0 %v923_v12  ;;  %v2382_v55 = vpop.eup %1711 }
 0x35b   : > { %1725 = vpow2.f32 %v897_v28  ;;  %v2386_v14 = vpop.eup %1713 }
 0x35c   : > { %1068 = vmatmul.mubr.bf16.gmra.mrb[16].mxu1 %v973_v53  ;;  %v2390_v41 = vpop.eup %1715  ;;  %v935_v18 = vadd.f32 %v2386_v14, %v2382_v55 }
 0x35d   : > { %927 = vadd.xlane.f32.xlu1 %v926_v33  ;;  %v976_v35 = vpack.c.bf16 %v2390_v41, %v2386_v14  ;;  %v2394_v34 = vpop.eup %1717 }
 0x35e   : > { %930 = vadd.xlane.f32.xlu0 %v929_v39  ;;  %v975_v42 = vpack.c.bf16 %v2394_v34, %v2382_v55  ;;  %v938_v44 = vadd.f32 %v2394_v34, %v2390_v41 }
 0x35f   : > { %1075 = vmatprep.mubr.bf16.mxu1 %v976_v35 }
 0x361   : > { %933 = vadd.xlane.f32.xlu1 %v932_v38 }
 0x362   : > { %v2400_v19 = vpop.eup %1719  ;;  %936 = vadd.xlane.f32.xlu0 %v935_v18 }
 0x363   : > { %v2404_v43 = vpop.eup %1721 }
 0x364   : > { %v2408_v22 = vpop.eup %1723  ;;  %1076 = vmatmul.mubr.bf16.gmra.mrb[20].mxu1 %v975_v42  ;;  %v941_v50 = vadd.f32 %v2404_v43, %v2400_v19 }
 0x365   : > { %v2412_v54 = vpop.eup %1725  ;;  %939 = vadd.xlane.f32.xlu1 %v938_v44  ;;  %v977_v46 = vpack.c.bf16 %v2408_v22, %v2400_v19 }
 0x366   : > { %942 = vadd.xlane.f32.xlu0 %v941_v50  ;;  %v978_v56 = vpack.c.bf16 %v2412_v54, %v2404_v43  ;;  %v944_v57 = vadd.f32 %v2412_v54, %v2408_v22 }
 0x368   : > { %1083 = vmatprep.mubr.bf16.mxu1 %v978_v56 }
 0x369   : > { %945 = vadd.xlane.f32.xlu1 %v944_v57 }
 0x36c   : > { %1084 = vmatmul.mubr.bf16.gmra.mrb[24].mxu1 %v977_v46 }
 0x3d7   : > { %v901_v0 = vpop.xlane.xlu0 %900 }
 0x3d8   : > { %1727 = vrcp.f32 %v901_v0 }
 0x3da   : > { %v904_v59 = vpop.xlane.xlu1 %903 }
 0x3db   : > { %1729 = vrcp.f32 %v904_v59  ;;  %v907_v60 = vpop.xlane.xlu0 %906 }
 0x3dc   : > { %1731 = vrcp.f32 %v907_v60 }
 0x3de   : > { %v910_v47 = vpop.xlane.xlu1 %909 }
 0x3df   : > { %1733 = vrcp.f32 %v910_v47  ;;  %v913_v49 = vpop.xlane.xlu0 %912 }
 0x3e0   : > { %1735 = vrcp.f32 %v913_v49 }
 0x3e2   : > { %v2420_v2 = vpop.eup %1727  ;;  %v916_v4 = vpop.xlane.xlu1 %915 }
 0x3e3   : > { %v1166_v3 = vmul.f32 %v2420_v2, %v2313_v8  ;;  %v1167_v5 = vmul.f32 %v2420_v2, %v2317_v26  ;;  %1737 = vrcp.f32 %v916_v4  ;;  %v919_v9 = vpop.xlane.xlu0 %918 }
 0x3e4   : > { %1739 = vrcp.f32 %v919_v9 }
 0x3e5   : > { %v2426_v27 = vpop.eup %1729  ;;  %1198 = vst [vmem:[%s2054_s15] sm:$0xff] %v1166_v3  ;;  %1199 = vst [vmem:[%s2054_s15 + $0x8] sm:$0xff] %v1167_v5 }
 0x3e6   : > { %v2430_v31 = vpop.eup %1731  ;;  %v1168_v6 = vmul.f32 %v2426_v27, %v2322_v30  ;;  %v1169_v8 = vmul.f32 %v2426_v27, %v2326_v16  ;;  %v922_v25 = vpop.xlane.xlu1 %921 }
 0x3e7   : > { %v1170_v26 = vmul.f32 %v2430_v31, %v2270_v13  ;;  %v1171_v23 = vmul.f32 %v2430_v31, %v2280_v40  ;;  %1741 = vrcp.f32 %v922_v25  ;;  %v925_v52 = vpop.xlane.xlu0 %924 }
 0x3e8   : > { %1200 = vst [vmem:[%s2054_s15 + $0x10] sm:$0xff] %v1168_v6  ;;  %1201 = vst [vmem:[%s2054_s15 + $0x18] sm:$0xff] %v1169_v8  ;;  %1743 = vrcp.f32 %v925_v52 }
 0x3e9   : > { %v2442_v10 = vpop.eup %1733  ;;  %1202 = vst [vmem:[%s2054_s15 + $0x20] sm:$0xff] %v1170_v26  ;;  %1203 = vst [vmem:[%s2054_s15 + $0x28] sm:$0xff] %v1171_v23 }
 0x3ea   : > { %v2446_v30 = vpop.eup %1735  ;;  %v1172_v13 = vmul.f32 %v2442_v10, %v2272_v32  ;;  %v1173_v40 = vmul.f32 %v2442_v10, %v2276_v36  ;;  %v928_v16 = vpop.xlane.xlu1 %927 }
 0x3eb   : > { %v1174_v24 = vmul.f32 %v2446_v30, %v2288_v58  ;;  %v1175_v28 = vmul.f32 %v2446_v30, %v2290_v1  ;;  %1745 = vrcp.f32 %v928_v16  ;;  %v931_v12 = vpop.xlane.xlu0 %930 }
 0x3ec   : > { %1204 = vst [vmem:[%s2054_s15 + $0x30] sm:$0xff] %v1172_v13  ;;  %1205 = vst [vmem:[%s2054_s15 + $0x38] sm:$0xff] %v1173_v40  ;;  %1747 = vrcp.f32 %v931_v12 }
 0x3ed   : > { %v2458_v53 = vpop.eup %1737  ;;  %1206 = vst [vmem:[%s2054_s15 + $0x40] sm:$0xff] %v1174_v24  ;;  %1207 = vst [vmem:[%s2054_s15 + $0x48] sm:$0xff] %v1175_v28 }
 0x3ee   : > { %v2462_v32 = vpop.eup %1739  ;;  %v1176_v36 = vmul.f32 %v2458_v53, %v2293_v62  ;;  %v1177_v58 = vmul.f32 %v2458_v53, %v2297_v63  ;;  %v934_v1 = vpop.xlane.xlu1 %933 }
 0x3ef   : > { %v1178_v33 = vmul.f32 %v2462_v32, %v2304_v17  ;;  %v1179_v39 = vmul.f32 %v2462_v32, %v2306_v29  ;;  %1749 = vrcp.f32 %v934_v1  ;;  %v937_v35 = vpop.xlane.xlu0 %936 }
 0x3f0   : > { %1208 = vst [vmem:[%s2054_s15 + $0x50] sm:$0xff] %v1176_v36  ;;  %1209 = vst [vmem:[%s2054_s15 + $0x58] sm:$0xff] %v1177_v58  ;;  %1751 = vrcp.f32 %v937_v35 }
 0x3f1   : > { %v2474_v38 = vpop.eup %1741  ;;  %1210 = vst [vmem:[%s2054_s15 + $0x60] sm:$0xff] %v1178_v33  ;;  %1211 = vst [vmem:[%s2054_s15 + $0x68] sm:$0xff] %v1179_v39 }
 0x3f2   : > { %v2478_v62 = vpop.eup %1743  ;;  %v1180_v63 = vmul.f32 %v2474_v38, %v2308_v7  ;;  %v1181_v17 = vmul.f32 %v2474_v38, %v2311_v21  ;;  %v940_v29 = vpop.xlane.xlu1 %939 }
 0x3f3   : > { %v1182_v18 = vmul.f32 %v2478_v62, %v2354_v61  ;;  %v1183_v42 = vmul.f32 %v2478_v62, %v2342_v48  ;;  %1753 = vrcp.f32 %v940_v29  ;;  %v943_v44 = vpop.xlane.xlu0 %942 }
 0x3f4   : > { %1212 = vst [vmem:[%s2054_s15 + $0x70] sm:$0xff] %v1180_v63  ;;  %1213 = vst [vmem:[%s2054_s15 + $0x78] sm:$0xff] %v1181_v17  ;;  %1755 = vrcp.f32 %v943_v44 }
 0x3f5   : > { %v2490_v7 = vpop.eup %1745  ;;  %1214 = vst [vmem:[%s2054_s15 + $0x80] sm:$0xff] %v1182_v18  ;;  %1215 = vst [vmem:[%s2054_s15 + $0x88] sm:$0xff] %v1183_v42 }
 0x3f6   : > { %v2494_v21 = vpop.eup %1747  ;;  %v1184_v61 = vmul.f32 %v2490_v7, %v2346_v45  ;;  %v1185_v48 = vmul.f32 %v2490_v7, %v2340_v20  ;;  %v946_v50 = vpop.xlane.xlu1 %945 }
 0x3f7   : > { %v1186_v56 = vmul.f32 %v2494_v21, %v2378_v37  ;;  %v1187_v57 = vmul.f32 %v2494_v21, %v2366_v15  ;;  %1757 = vrcp.f32 %v946_v50 }
 0x3f8   : > { %1216 = vst [vmem:[%s2054_s15 + $0x90] sm:$0xff] %v1184_v61  ;;  %1217 = vst [vmem:[%s2054_s15 + $0x98] sm:$0xff] %v1185_v48 }
 0x3f9   : > { %v2506_v46 = vpop.eup %1749  ;;  %1218 = vst [vmem:[%s2054_s15 + $0xa0] sm:$0xff] %v1186_v56  ;;  %1219 = vst [vmem:[%s2054_s15 + $0xa8] sm:$0xff] %v1187_v57 }
 0x3fa   : > { %v2510_v45 = vpop.eup %1751  ;;  %v1188_v20 = vmul.f32 %v2506_v46, %v2370_v51  ;;  %v1189_v37 = vmul.f32 %v2506_v46, %v2364_v11 }
 0x3fb   : > { %v1190_v15 = vmul.f32 %v2510_v45, %v2382_v55  ;;  %v1191_v0 = vmul.f32 %v2510_v45, %v2386_v14 }
 0x3fc   : > { %1220 = vst [vmem:[%s2054_s15 + $0xb0] sm:$0xff] %v1188_v20  ;;  %1221 = vst [vmem:[%s2054_s15 + $0xb8] sm:$0xff] %v1189_v37 }
 0x3fd   : > { %v2522_v59 = vpop.eup %1753  ;;  %1222 = vst [vmem:[%s2054_s15 + $0xc0] sm:$0xff] %v1190_v15  ;;  %1223 = vst [vmem:[%s2054_s15 + $0xc8] sm:$0xff] %v1191_v0 }
 0x3fe   : > { %v2526_v51 = vpop.eup %1755  ;;  %v1192_v11 = vmul.f32 %v2522_v59, %v2394_v34  ;;  %v1193_v55 = vmul.f32 %v2522_v59, %v2390_v41 }
 0x3ff   : > { %v1194_v60 = vmul.f32 %v2526_v51, %v2400_v19  ;;  %v1195_v14 = vmul.f32 %v2526_v51, %v2404_v43 }
 0x400   : > { %1224 = vst [vmem:[%s2054_s15 + $0xd0] sm:$0xff] %v1192_v11  ;;  %1225 = vst [vmem:[%s2054_s15 + $0xd8] sm:$0xff] %v1193_v55 }
 0x401   : > { %v2538_v47 = vpop.eup %1757  ;;  %1226 = vst [vmem:[%s2054_s15 + $0xe0] sm:$0xff] %v1194_v60  ;;  %1227 = vst [vmem:[%s2054_s15 + $0xe8] sm:$0xff] %v1195_v14 }
 0x402   : > { %v1196_v49 = vmul.f32 %v2538_v47, %v2408_v22  ;;  %v1197_v34 = vmul.f32 %v2538_v47, %v2412_v54 }
 0x404   : > { %1228 = vst [vmem:[%s2054_s15 + $0xf0] sm:$0xff] %v1196_v49  ;;  %1229 = vst [vmem:[%s2054_s15 + $0xf8] sm:$0xff] %v1197_v34 }
 0x40f   : > { %v1503_v41 = vpop.f32.mrb[0].mxu1 }
 0x410   : > { %v1504_v4 = vpop.f32.mrb[1].mxu1 }
 0x411   : > { %v1505_v19 = vadd.f32 %v1504_v4, %v1503_v41  ;;  %v1506_v3 = vpop.f32.mrb[2].mxu1 }
 0x412   : > { %v1507_v5 = vpop.f32.mrb[3].mxu1 }
 0x413   : > { %v1094_v43 = vmul.f32 %v2430_v31, %v1505_v19  ;;  %v1508_v9 = vadd.f32 %v1507_v5, %v1506_v3  ;;  %v1141_v19 = vstv %s1140_s7  ;;  %s1470_s7 = sshll.u32 %s2578_s10, 7  ;;  %s1255_s10 = sshll.u32 %s2050_s13, 4  ;;  %s2613_s10 = int_to_ptr.vmem [resolvable:$true] %s1255_s10 }
 0x414   : > { %s2593_s27 = scalar_lea.hbm %s2730_s5, %s1470_s7  ;;  %s2611_s0 = scalar_lea.hbm %s2729_s4, %s1470_s7 }
 0x415   : > { %v1095_v6 = vmul.f32 %v2442_v10, %v1508_v9 }
 0x417   : > { %v1509_v8 = vpop.f32.mrb[4].mxu1 }
 0x418   : > { %v1510_v25 = vpop.f32.mrb[5].mxu1 }
 0x419   : > { %v1511_v26 = vadd.f32 %v1510_v25, %v1509_v8  ;;  %v1512_v23 = vpop.f32.mrb[6].mxu1  ;;  %v1152_v25 = vld [vmem:[%s2567_s20 + $0x20] sm:$0xff] }
 0x41a   : > { %v1513_v22 = vpop.f32.mrb[7].mxu1 }
 0x41b   : > { %v1096_v52 = vmul.f32 %v2446_v30, %v1511_v26  ;;  %v1514_v54 = vadd.f32 %v1513_v22, %v1512_v23 }
 0x41d   : > { %v1097_v13 = vmul.f32 %v2458_v53, %v1514_v54 }
 0x41f   : > { %v1515_v40 = vpop.f32.mrb[8].mxu1 }
 0x420   : > { %v1516_v16 = vpop.f32.mrb[9].mxu1  ;;  %v1497_v24 = vpop.f32.mrb[32].mxu0 }
 0x421   : > { %v1517_v28 = vadd.f32 %v1516_v16, %v1515_v40  ;;  %v1518_v12 = vpop.f32.mrb[10].mxu1  ;;  %v1498_v36 = vpop.f32.mrb[33].mxu0 }
 0x422   : > { %v1499_v31 = vadd.f32 %v1498_v36, %v1497_v24  ;;  %v1519_v58 = vpop.f32.mrb[11].mxu1  ;;  %v1500_v1 = vpop.f32.mrb[34].mxu0 }
 0x423   : > { %v1098_v10 = vmul.f32 %v2462_v32, %v1517_v28  ;;  %v1520_v33 = vadd.f32 %v1519_v58, %v1518_v12  ;;  %v1501_v39 = vpop.f32.mrb[35].mxu0 }
 0x424   : > { %v1502_v35 = vadd.f32 %v1501_v39, %v1500_v1  ;;  %v1092_v63 = vmul.f32 %v2420_v2, %v1499_v31 }
 0x425   : > { %v1099_v30 = vmul.f32 %v2474_v38, %v1520_v33 }
 0x426   : > { %v1093_v53 = vmul.f32 %v2426_v27, %v1502_v35  ;;  %1108 = vxpose.xlu0.b32.start [1/16] (narrow) %v1092_v63, 32 }
 0x427   : > { %v1521_v17 = vpop.f32.mrb[12].mxu1 }
 0x428   : > { %v1522_v29 = vpop.f32.mrb[13].mxu1 }
 0x429   : > { %v1523_v18 = vadd.f32 %v1522_v29, %v1521_v17  ;;  %v1524_v42 = vpop.f32.mrb[14].mxu1 }
 0x42a   : > { %v1525_v44 = vpop.f32.mrb[15].mxu1  ;;  %1109 = vxpose.xlu0.b32.cont [2/16] (narrow) %v1093_v53, 32 }
 0x42b   : > { %v1100_v61 = vmul.f32 %v2478_v62, %v1523_v18  ;;  %v1526_v48 = vadd.f32 %v1525_v44, %v1524_v42 }
 0x42d   : > { %v1101_v32 = vmul.f32 %v2490_v7, %v1526_v48 }
 0x42e   : > { %1110 = vxpose.xlu0.b32.cont [3/16] (narrow) %v1094_v43, 32  ;;  %v1151_v43 = vld [vmem:[%s2567_s20 + $0x10] sm:$0xff] }
 0x42f   : > { %v1527_v50 = vpop.f32.mrb[16].mxu1 }
 0x430   : > { %v1528_v56 = vpop.f32.mrb[17].mxu1 }
 0x431   : > { %v1529_v2 = vadd.f32 %v1528_v56, %v1527_v50  ;;  %v1530_v57 = vpop.f32.mrb[18].mxu1 }
 0x432   : > { %v1531_v38 = vpop.f32.mrb[19].mxu1  ;;  %1111 = vxpose.xlu0.b32.cont [4/16] (narrow) %v1095_v6, 32 }
 0x433   : > { %v1102_v27 = vmul.f32 %v2494_v21, %v1529_v2  ;;  %v1532_v20 = vadd.f32 %v1531_v38, %v1530_v57 }
 0x435   : > { %v1103_v37 = vmul.f32 %v2506_v46, %v1532_v20 }
 0x436   : > { %1112 = vxpose.xlu0.b32.cont [5/16] (narrow) %v1096_v52, 32  ;;  %v1153_v52 = vld [vmem:[%s2567_s20 + $0x30] sm:$0xff] }
 0x437   : > { %v1533_v15 = vpop.f32.mrb[20].mxu1 }
 0x438   : > { %v1534_v0 = vpop.f32.mrb[21].mxu1 }
 0x439   : > { %v1535_v11 = vadd.f32 %v1534_v0, %v1533_v15  ;;  %v1536_v62 = vpop.f32.mrb[22].mxu1 }
 0x43a   : > { %v1537_v55 = vpop.f32.mrb[23].mxu1  ;;  %1113 = vxpose.xlu0.b32.cont [6/16] (narrow) %v1097_v13, 32 }
 0x43b   : > { %v1104_v7 = vmul.f32 %v2510_v45, %v1535_v11  ;;  %v1538_v60 = vadd.f32 %v1537_v55, %v1536_v62 }
 0x43d   : > { %v1105_v14 = vmul.f32 %v2522_v59, %v1538_v60 }
 0x43e   : > { %1114 = vxpose.xlu0.b32.cont [7/16] (narrow) %v1098_v10, 32 }
 0x43f   : > { %v1539_v49 = vpop.f32.mrb[24].mxu1 }
 0x440   : > { %v1540_v34 = vpop.f32.mrb[25].mxu1 }
 0x441   : > { %v1541_v41 = vadd.f32 %v1540_v34, %v1539_v49  ;;  %v1542_v21 = vpop.f32.mrb[26].mxu1 }
 0x442   : > { %v1543_v4 = vpop.f32.mrb[27].mxu1  ;;  %1115 = vxpose.xlu0.b32.cont [8/16] (narrow) %v1099_v30, 32 }
 0x443   : > { %v1544_v46 = vadd.f32 %v1543_v4, %v1542_v21  ;;  %v1106_v45 = vmul.f32 %v2526_v51, %v1541_v41  ;;  %v1150_v51 = vld [vmem:[%s2567_s20] sm:$0xff] }
 0x445   : > { %v1107_v59 = vmul.f32 %v2538_v47, %v1544_v46 }
 0x446   : > { %1116 = vxpose.xlu0.b32.cont [9/16] (narrow) %v1100_v61, 32 }
 0x44a   : > { %1117 = vxpose.xlu0.b32.cont [10/16] (narrow) %v1101_v32, 32 }
 0x44e   : > { %1118 = vxpose.xlu0.b32.cont [11/16] (narrow) %v1102_v27, 32 }
 0x452   : > { %1119 = vxpose.xlu0.b32.cont [12/16] (narrow) %v1103_v37, 32 }
 0x456   : > { %1120 = vxpose.xlu0.b32.cont [13/16] (narrow) %v1104_v7, 32 }
 0x45a   : > { %1121 = vxpose.xlu0.b32.cont [14/16] (narrow) %v1105_v14, 32 }
 0x45e   : > { %1122 = vxpose.xlu0.b32.cont [15/16] (narrow) %v1106_v45, 32 }
 0x462   : > { %1123 = vxpose.xlu0.b32.end [16/16] (narrow) %v1107_v59, 32 }
 0x4a6   : > { %v1124_v3 = vpop.trf.xlu0 }
 0x4a7   : > { %v1142_v5 = vmul.f32 %v1141_v19, %v1124_v3 }
 0x4a9   : > { %v1154_v47 = vadd.f32 %v1150_v51, %v1142_v5  ;;  %1162 = vst [vmem:[%s2052_s14] sm:$0xff] %v1142_v5 }
 0x4aa   : > { %v1125_v9 = vpop.trf.xlu0 }
 0x4ab   : > { %1158 = vst [vmem:[%s2050_s13] sm:$0xff] %v1154_v47  ;;  %v1143_v6 = vmul.f32 %v1141_v19, %v1125_v9 }
 0x4ad   : > { %v1155_v8 = vadd.f32 %v1151_v43, %v1143_v6  ;;  %1163 = vst [vmem:[%s2052_s14 + $0x8] sm:$0xff] %v1143_v6 }
 0x4ae   : > { %v1126_v26 = vpop.trf.xlu0 }
 0x4af   : > { %1159 = vst [vmem:[%s2050_s13 + $0x8] sm:$0xff] %v1155_v8  ;;  %v1144_v23 = vmul.f32 %v1141_v19, %v1126_v26 }
 0x4b1   : > { %v1156_v22 = vadd.f32 %v1152_v25, %v1144_v23  ;;  %1164 = vst [vmem:[%s2052_s14 + $0x10] sm:$0xff] %v1144_v23 }
 0x4b2   : > { %v1127_v54 = vpop.trf.xlu0 }
 0x4b3   : > { %1160 = vst [vmem:[%s2050_s13 + $0x10] sm:$0xff] %v1156_v22  ;;  %v1145_v13 = vmul.f32 %v1141_v19, %v1127_v54 }
 0x4b5   : > { %v1157_v40 = vadd.f32 %v1153_v52, %v1145_v13  ;;  %1165 = vst [vmem:[%s2052_s14 + $0x18] sm:$0xff] %v1145_v13 }
 0x4b6   : > { %1772 = shalt.err (!%p1769_p7)
}
 0x4b7   : > { %s1773_s14 = scalar_lea.hbm %s2593_s27, 512  ;;  %s1777_s8 = scalar_lea.hbm %s2730_s5, 2048 }
 0x4b8   : > { %p1774_p9 = scmp.ne.s32.totalorder %s2593_s27, %s1773_s14  ;;  %p1778_p12 = scmp.lt.u32.totalorder %s2593_s27, %s2730_s5 }
 0x4b9   : > { %p1779_p13 = scmp.lt.u32.totalorder %s1777_s8, %s1773_s14  ;;  %p1781_p1 = scmp.lt.u32.totalorder %s1773_s14, %s2593_s27 }
 0x4ba   : > { %p1775_p10 = pnand %p1774_p9, %p2016_p3 }
 0x4bb   : > { %p1780_p0 = por %p1779_p13, %p1778_p12 }
 0x4bc   : > { %p1776_p11 = pneg %p1775_p10 }
 0x4bd   : > { %p1782_p2 = por %p1781_p1, %p1780_p0 }
 0x4bf   : > { %p1783_p4 = pnand %p1782_p2, %p1776_p11 }
 0x4c1   : > { %1786 = shalt.err (!%p1783_p4)
}
 0x4c2   : > { %s1919_s2 = smov 128   ;;  %s1920_s18 = smov 256   ;;  %1161 = vst [vmem:[%s2050_s13 + $0x18] sm:$0xff] %v1157_v40 }
 0x4c3   : > { %s1921_s20 = smov 8   ;;  %s1787_s1 = scalar_lea.vmem %s2600_s21, 4096 }
 0x4c4   : > { %1574 = dma.vmem_to_hbm [thread:$0]  (%p2016_p3), %s2596_s19, 512, %s2593_s27, %s1236_s26, %s1919_s2, %s1920_s18, %s1921_s20  }
 0x4c5   : > { %p1788_p5 = scmp.ne.s32.totalorder %s2600_s21, %s1787_s1  ;;  %s1922_s14 = smov [#allocation10]  }
 0x4c6   : > { %s1791_s7 = sshll.u32 %s1922_s14, 4  ;;  %s1792_s7 = int_to_ptr.vmem [resolvable:$false] %s1791_s7 }
 0x4c7   : > { %p1789_p6 = pnand %p1788_p5, %p2016_p3  ;;  %s1793_s15 = scalar_lea.vmem %s1792_s7, 8192 }
 0x4c8   : > { %p1794_p9 = scmp.lt.s32.totalorder %s2600_s21, %s1792_s7  ;;  %p1795_p10 = scmp.lt.s32.totalorder %s1793_s15, %s1787_s1 }
 0x4c9   : > { %p1790_p7 = pneg %p1789_p6 }
 0x4ca   : > { %p1796_p11 = por %p1795_p10, %p1794_p9 }
 0x4cc   : > { %p1797_p12 = pnand %p1796_p11, %p1790_p7 }
 0x4ce   : > { %1800 = shalt.err (!%p1797_p12)
}
 0x4cf   : > { %s1801_s13 = scalar_lea.hbm %s2605_s22, 4096  ;;  %s1805_s8 = scalar_lea.hbm %s2731_s6, 16384 }
 0x4d0   : > { %p1802_p13 = scmp.ne.s32.totalorder %s2605_s22, %s1801_s13  ;;  %p1806_p2 = scmp.lt.u32.totalorder %s2605_s22, %s2731_s6 }
 0x4d1   : > { %p1807_p4 = scmp.lt.u32.totalorder %s1805_s8, %s1801_s13  ;;  %p1809_p6 = scmp.lt.u32.totalorder %s1801_s13, %s2605_s22 }
 0x4d2   : > { %p1803_p0 = pnand %p1802_p13, %p2016_p3 }
 0x4d3   : > { %p1808_p5 = por %p1807_p4, %p1806_p2 }
 0x4d4   : > { %p1804_p1 = pneg %p1803_p0 }
 0x4d5   : > { %p1810_p7 = por %p1809_p6, %p1808_p5 }
 0x4d7   : > { %p1811_p9 = pnand %p1810_p7, %p1804_p1 }
 0x4d9   : > { %1814 = shalt.err (!%p1811_p9)
}
 0x4da   : > { %s1923_s1 = smov 16   ;;  %s1231_s14 = scalar_lea.sflag [#allocation7], %s2039_s17 }
 0x4db   : > { %1575 = dma.vmem_to_hbm [thread:$0]  (%p2016_p3), %s2600_s21, 4096, %s2605_s22, %s1236_s26, %s1920_s18, %s1920_s18, %s1923_s1  }
 0x4dc   : > { %s1815_s7 = scalar_lea.vmem %s2613_s10, 512  ;;  %s1924_s15 = smov [#allocation6]  }
 0x4dd   : > { %p1816_p10 = scmp.ne.s32.totalorder %s2613_s10, %s1815_s7  ;;  %s1819_s13 = sshll.u32 %s1924_s15, 4  ;;  %s1820_s13 = int_to_ptr.vmem [resolvable:$false] %s1819_s13 }
 0x4de   : > { %s1821_s19 = scalar_lea.vmem %s1820_s13, 1024  ;;  %p1822_p13 = scmp.lt.s32.totalorder %s2613_s10, %s1820_s13 }
 0x4df   : > { %p1817_p11 = pnand %p1816_p10, %p2016_p3  ;;  %p1823_p0 = scmp.lt.s32.totalorder %s1821_s19, %s1815_s7 }
 0x4e1   : > { %p1818_p12 = pneg %p1817_p11  ;;  %p1824_p1 = por %p1823_p0, %p1822_p13 }
 0x4e3   : > { %p1825_p2 = pnand %p1824_p1, %p1818_p12 }
 0x4e5   : > { %1828 = shalt.err (!%p1825_p2)
}
 0x4e6   : > { %s1829_s3 = scalar_lea.hbm %s2611_s0, 512  ;;  %s1833_s26 = scalar_lea.hbm %s2729_s4, 2048 }
 0x4e7   : > { %p1830_p4 = scmp.ne.s32.totalorder %s2611_s0, %s1829_s3  ;;  %p1834_p7 = scmp.lt.u32.totalorder %s2611_s0, %s2729_s4 }
 0x4e8   : > { %p1835_p9 = scmp.lt.u32.totalorder %s1833_s26, %s1829_s3  ;;  %p1837_p11 = scmp.lt.u32.totalorder %s1829_s3, %s2611_s0 }
 0x4e9   : > { %p1831_p5 = pnand %p1830_p4, %p2016_p3 }
 0x4ea   : > { %p1836_p10 = por %p1835_p9, %p1834_p7 }
 0x4eb   : > { %p1832_p6 = pneg %p1831_p5 }
 0x4ec   : > { %p1838_p12 = por %p1837_p11, %p1836_p10 }
 0x4ee   : > { %p1839_p13 = pnand %p1838_p12, %p1832_p6 }
 0x4f0   : > { %1842 = shalt.err (!%p1839_p13)
}
 0x4f1   : > { %1573 = dma.vmem_to_hbm [thread:$0]  (%p2016_p3), %s2613_s10, 512, %s2611_s0, %s1231_s14, %s1919_s2, %s1920_s18, %s1921_s20  }
 0x4f2 PF: > { %p1589_p0 = scmp.ge.s32.totalorder %s1913_s30, 2  ;;  %s1306_s9 = sand.u32 1, %s1885_s23  }
 0x4f3   : > { %s1307_s29 = scalar_lea.sflag [#allocation7], %s1306_s9 }
 0x4f4   : > { %p1580_p1 = pnand %p1589_p0, %p2027_p8 }
 0x4f6   : > { %1876 = dma.done.wait (!%p1580_p1), %s1307_s29, 512  }
 0x4f7   : > { %1878 = vsyncadd (!%p1580_p1), %s1307_s29, 4294966784  ;;  %s2749_s11 = sadd.s32 4294967294, %s1913_s30  }
 0x4f8   : > { %s1315_s1 = sand.u32 1, %s2749_s11  }
 0x4f9   : > { %s1316_s7 = scalar_lea.sflag [#allocation9], %s1315_s1 }
 0x4fa   : > { %1880 = dma.done.wait (!%p1580_p1), %s1316_s7, 4608  }
 0x4fb   : > { %1882 = vsyncadd (!%p1580_p1), %s1316_s7, 4294962688  ;;  %s24_s30 = sadd.s32 1, %s1913_s30   ;;  %s2750_s27 = sld [smem:[#allocation13_spill]] }
 0x4fc   : > { %p21_p3 = scmp.ge.s32.totalorder %s24_s30, 6   ;;  %s2751_s17 = sld [smem:[#allocation14_spill]] }
 0x4fd   : > { %s2752_s29 = sld [smem:[#allocation15_spill]]  ;;  %s2753_s23 = smov %s1889_s24 }
 0x4fe   : > { %s2754_s24 = smov %s1893_s25  ;;  %s2755_s25 = smov %s2036_s16 }
 0x4ff   : > { %s2756_s26 = smov %s1905_s28  ;;  %23 = sbr.rel (!%p21_p3) target bundleno = 12 (0xc), region = 109 }
 0x502   : > { %s2757_s28 = smov %s2751_s17 }
 0x506   :  { %1330 = vsyncpa [#allocation7], 1 }
 0x507   :  { %1332 = vsyncpa [#allocation7 + $0x1], 1 }
 0x508   :  { %1333 = vsyncpa [#allocation9], 1 }
 0x509   :  { %1335 = vsyncpa [#allocation9 + $0x1], 1 }

</bundles_post_ra>
